<compile_context>
chip_gen: v7x
topology: tpu7x:2x2x1
jax: 0.10.0
libtpu: 0.0.40
codegen_flags: <defaults>
</compile_context>

<pallas_src>
import functools
import math

import jax
import jax.numpy as jnp
from jax import lax
from jax.experimental import pallas as pl
from jax.experimental.pallas import tpu as pltpu


# ------------------------------ in-kernel helpers ----------------------------


def _mxu_dot(a, b):
    """MXU matmul: bf16 operands, f32 accumulation."""
    return jnp.dot(a.astype(jnp.bfloat16), b.astype(jnp.bfloat16),
                   preferred_element_type=jnp.float32)


def _softplus(z):
    # numerically stable softplus (f32 elementwise — EUP/VPU)
    return jnp.maximum(z, 0.0) + jnp.log1p(jnp.exp(-jnp.abs(z)))


def _batchnorm(z, gamma, beta, m):
    # BatchNorm1d, training-mode biased stats, eps = 1e-5.
    # Single pass: sum and sum-of-squares (no second centered-variance pass).
    s = jnp.sum(z, axis=0, keepdims=True)
    ss = jnp.sum(z * z, axis=0, keepdims=True)
    mean = s * (1.0 / m)
    var = jnp.maximum(ss * (1.0 / m) - mean * mean, 0.0)
    inv = lax.rsqrt(var + 1e-5)
    return gamma * (z - mean) * inv + beta


def _ffn(x, w1s, b1s, w2, b2, w3, b3, d):
    # w1s/b1s fuse the first FFN layer and the linear shortcut ([D, 2D]) so x
    # is pushed through the MXU once; split the result into the two heads.
    y = _mxu_dot(x, w1s) + b1s
    h = jnp.maximum(y[:, :d], 0.0)
    shortcut = y[:, d:]
    h = jnp.maximum(_mxu_dot(h, w2) + b2, 0.0)
    h = jnp.maximum(_mxu_dot(h, w3) + b3, 0.0)
    return h + shortcut


# ------------------------------ fused forward kernel -------------------------


def _infograph_kernel(*refs, num_layers, hidden_dim, num_nodes, num_graphs):
    n_in = 4 + 6 * num_layers + 12
    in_refs = refs[:n_in]
    out_ref = refs[n_in]          # [1, 1] scalar loss
    hp_ref = refs[n_in + 1]       # VMEM scratch [N, hidden*num_layers]

    x_ref, adj_ref, pool_ref, posm_ref = in_refs[:4]
    gin_refs = in_refs[4:4 + 6 * num_layers]
    gff_refs = in_refs[4 + 6 * num_layers:4 + 6 * num_layers + 6]
    lff_refs = in_refs[4 + 6 * num_layers + 6:]

    adj_bf = adj_ref[...].astype(jnp.bfloat16)   # cast once, reused every layer
    h = x_ref[...]

    # ----- GIN encoder -----
    for l in range(num_layers):
        w1, b1, w2, b2, gamma, beta = (r[...] for r in gin_refs[6 * l:6 * l + 6])
        agg = jnp.dot(adj_bf, h.astype(jnp.bfloat16),
                      preferred_element_type=jnp.float32)    # A @ h
        z = h + agg                                          # (1+eps)*x + aggr, eps=0
        z = jnp.maximum(_mxu_dot(z, w1) + b1, 0.0)           # MLP Linear + ReLU
        z = jnp.maximum(_mxu_dot(z, w2) + b2, 0.0)           # MLP Linear + outer F.relu
        z = _batchnorm(z, gamma, beta, float(num_nodes))     # BatchNorm1d (train stats)
        hp_ref[:, l * hidden_dim:(l + 1) * hidden_dim] = z   # layer-concat in VMEM
        h = z

    d = hidden_dim * num_layers
    hp = hp_ref[...]                                         # [N, D] patch reps
    h_global = _mxu_dot(pool_ref[...], hp)                   # global_add_pool: [G, D]

    # ----- discriminator heads -----
    gffv = [r[...] for r in gff_refs]
    lffv = [r[...] for r in lff_refs]
    g_enc = _ffn(h_global, *gffv, d)                         # [G, D]
    l_enc = _ffn(hp, *lffv, d)                               # [N, D]

    # scores[n, g] = <l_enc[n], g_enc[g]>; contract the D axes directly
    # (no [D, G] transpose — keeps D on the lane axis for the MXU).
    scores = lax.dot_general(
        l_enc.astype(jnp.bfloat16), g_enc.astype(jnp.bfloat16),
        dimension_numbers=(((1,), (1,)), ((), ())),
        preferred_element_type=jnp.float32)                  # [N, G]

    # ----- JSD local-global loss (f32) -----
    pos_mask = posm_ref[...]
    neg_mask = 1.0 - pos_mask
    log2 = math.log(2.0)
    p = scores * pos_mask
    q = scores * neg_mask
    e_pos = jnp.sum(log2 - _softplus(-p)) / num_nodes
    # NOTE: requires num_graphs > 1 (otherwise divide-by-zero).
    e_neg = jnp.sum(_softplus(-q) + q - log2) / (num_nodes * (num_graphs - 1))
    out_ref[...] = jnp.full((1, 1), e_neg - e_pos, dtype=jnp.float32)


def _full_spec(shape):
    # whole-array block (all operands are tiny; single-step grid)
    return pl.BlockSpec(shape, lambda i: (0,) * len(shape))


def infograph_forward(params, x, adj, pool, pos_mask):
    """InfoGraph forward: returns the scalar unsupervised JSD loss."""
    num_layers = len(params["gin"])
    hidden = params["gin"][0]["w1"].shape[1]
    n = x.shape[0]
    g = pool.shape[0]
    embed = hidden * num_layers

    inputs = [x, adj, pool, pos_mask]
    for layer in params["gin"]:
        inputs += [layer["w1"], layer["b1"], layer["w2"], layer["b2"],
                   layer["gamma"], layer["beta"]]
    for ffp in (params["global_ff"], params["local_ff"]):
        inputs += [ffp["w1s"], ffp["b1s"], ffp["w2"], ffp["b2"],
                   ffp["w3"], ffp["b3"]]

    kern = functools.partial(
        _infograph_kernel, num_layers=num_layers, hidden_dim=hidden,
        num_nodes=n, num_graphs=g)

    out = pl.pallas_call(
        kern,
        grid=(1,),
        out_shape=jax.ShapeDtypeStruct((1, 1), jnp.float32),
        in_specs=[_full_spec(a.shape) for a in inputs],
        out_specs=pl.BlockSpec((1, 1), lambda i: (0, 0)),
        scratch_shapes=[pltpu.VMEM((n, embed), jnp.float32)],
        compiler_params=pltpu.CompilerParams(
            dimension_semantics=("arbitrary",)),
    )(*inputs)
    return out[0, 0]


# ------------------------- parameter initialization --------------------------


def xavier_uniform(key, fan_in, fan_out):
    a = math.sqrt(6.0 / (fan_in + fan_out))
    return jax.random.uniform(key, (fan_in, fan_out), jnp.float32, -a, a)


def init_ff(key, dim):
    ks = jax.random.split(key, 4)
    z = jnp.zeros((1, dim), jnp.float32)
    w1 = xavier_uniform(ks[0], dim, dim)
    ws = xavier_uniform(ks[3], dim, dim)
    return {
        # first layer + linear shortcut fused into one [D, 2D] weight
        "w1s": jnp.concatenate([w1, ws], axis=1),
        "b1s": jnp.zeros((1, 2 * dim), jnp.float32),
        "w2": xavier_uniform(ks[1], dim, dim), "b2": z,
        "w3": xavier_uniform(ks[2], dim, dim), "b3": z,
    }


def init_infograph(key, input_dim, hidden_dim, num_layers):
    kgin, kglob, kloc = jax.random.split(key, 3)
    layer_keys = jax.random.split(kgin, num_layers)
    gin = []
    for i in range(num_layers):
        k1, k2 = jax.random.split(layer_keys[i])
        ind = input_dim if i == 0 else hidden_dim
        gin.append({
            "w1": xavier_uniform(k1, ind, hidden_dim),
            "b1": jnp.zeros((1, hidden_dim), jnp.float32),
            "w2": xavier_uniform(k2, hidden_dim, hidden_dim),
            "b2": jnp.zeros((1, hidden_dim), jnp.float32),
            "gamma": jnp.ones((1, hidden_dim), jnp.float32),
            "beta": jnp.zeros((1, hidden_dim), jnp.float32),
        })
    embed_dim = hidden_dim * num_layers
    return {
        "gin": gin,
        "global_ff": init_ff(kglob, embed_dim),
        "local_ff": init_ff(kloc, embed_dim),
    }


# ----------------------------------- main -------------------------------------

if __name__ == "__main__":
    key = jax.random.PRNGKey(0)
    N_NODES = 16          # total nodes across the batch of graphs
    INPUT_DIM = 8
    HIDDEN_DIM = 32
    NUM_LAYERS = 3
    NUM_GRAPHS = 2
    NUM_EDGES = 40

    kx, ks0, kd0, ks1, kd1, kp = jax.random.split(key, 6)
    x = jax.random.normal(kx, (N_NODES, INPUT_DIM), jnp.float32)

    # two graphs of 8 nodes each; edges constrained within each graph
    half = N_NODES // 2
    src0 = jax.random.randint(ks0, (NUM_EDGES // 2,), 0, half)
    dst0 = jax.random.randint(kd0, (NUM_EDGES // 2,), 0, half)
    src1 = jax.random.randint(ks1, (NUM_EDGES // 2,), half, N_NODES)
    dst1 = jax.random.randint(kd1, (NUM_EDGES // 2,), half, N_NODES)
    edge_index = jnp.stack(
        [jnp.concatenate([src0, src1]), jnp.concatenate([dst0, dst1])], axis=0
    )  # [2, E], row 0 = source, row 1 = target (PyG convention)
    batch = jnp.concatenate(
        [jnp.zeros(half, jnp.int32), jnp.ones(N_NODES - half, jnp.int32)]
    )  # [N]

    # dense adjacency for GIN sum-aggregation: A[i, j] = #edges j -> i
    adj = jnp.zeros((N_NODES, N_NODES), jnp.float32).at[
        edge_index[1], edge_index[0]
    ].add(1.0)
    # one-hot pooling matrix and positive mask
    graph_ids = jnp.arange(NUM_GRAPHS)
    pool = (batch[None, :] == graph_ids[:, None]).astype(jnp.float32)      # [G, N]
    pos_mask = (batch[:, None] == graph_ids[None, :]).astype(jnp.float32)  # [N, G]

    params = init_infograph(kp, INPUT_DIM, HIDDEN_DIM, NUM_LAYERS)

    loss = infograph_forward(params, x, adj, pool, pos_mask)
    loss = jax.block_until_ready(loss)
    assert loss.shape == () and jnp.isfinite(loss)
    print("KERNEL_OK")
</pallas_src>

<mosaic_0001>
module attributes {stable_mosaic.version = 11 : i64} {
  func.func @_infograph_kernel(%arg0: i32, %arg1: memref<16x8xf32, #tpu.memory_space<vmem>>, %arg2: memref<16x16xf32, #tpu.memory_space<vmem>>, %arg3: memref<2x16xf32, #tpu.memory_space<vmem>>, %arg4: memref<16x2xf32, #tpu.memory_space<vmem>>, %arg5: memref<8x32xf32, #tpu.memory_space<vmem>>, %arg6: memref<1x32xf32, #tpu.memory_space<vmem>>, %arg7: memref<32x32xf32, #tpu.memory_space<vmem>>, %arg8: memref<1x32xf32, #tpu.memory_space<vmem>>, %arg9: memref<1x32xf32, #tpu.memory_space<vmem>>, %arg10: memref<1x32xf32, #tpu.memory_space<vmem>>, %arg11: memref<32x32xf32, #tpu.memory_space<vmem>>, %arg12: memref<1x32xf32, #tpu.memory_space<vmem>>, %arg13: memref<32x32xf32, #tpu.memory_space<vmem>>, %arg14: memref<1x32xf32, #tpu.memory_space<vmem>>, %arg15: memref<1x32xf32, #tpu.memory_space<vmem>>, %arg16: memref<1x32xf32, #tpu.memory_space<vmem>>, %arg17: memref<32x32xf32, #tpu.memory_space<vmem>>, %arg18: memref<1x32xf32, #tpu.memory_space<vmem>>, %arg19: memref<32x32xf32, #tpu.memory_space<vmem>>, %arg20: memref<1x32xf32, #tpu.memory_space<vmem>>, %arg21: memref<1x32xf32, #tpu.memory_space<vmem>>, %arg22: memref<1x32xf32, #tpu.memory_space<vmem>>, %arg23: memref<96x192xf32, #tpu.memory_space<vmem>>, %arg24: memref<1x192xf32, #tpu.memory_space<vmem>>, %arg25: memref<96x96xf32, #tpu.memory_space<vmem>>, %arg26: memref<1x96xf32, #tpu.memory_space<vmem>>, %arg27: memref<96x96xf32, #tpu.memory_space<vmem>>, %arg28: memref<1x96xf32, #tpu.memory_space<vmem>>, %arg29: memref<96x192xf32, #tpu.memory_space<vmem>>, %arg30: memref<1x192xf32, #tpu.memory_space<vmem>>, %arg31: memref<96x96xf32, #tpu.memory_space<vmem>>, %arg32: memref<1x96xf32, #tpu.memory_space<vmem>>, %arg33: memref<96x96xf32, #tpu.memory_space<vmem>>, %arg34: memref<1x96xf32, #tpu.memory_space<vmem>>, %arg35: memref<1x1xf32, #tpu.memory_space<vmem>>, %arg36: memref<16x96xf32, #tpu.memory_space<vmem>>) attributes {dimension_semantics = [#tpu.dimension_semantics<arbitrary>], iteration_bounds = array<i64: 1>, scalar_prefetch = 0 : i64, scratch_operands = 1 : i64, tpu.core_type = #tpu.core_type<tc>, window_params = [{pipeline_mode = #tpu.pipeline_mode<synchronous>, transform_indices = @transform_0, window_bounds = array<i64: 16, 8>}, {pipeline_mode = #tpu.pipeline_mode<synchronous>, transform_indices = @transform_1, window_bounds = array<i64: 16, 16>}, {pipeline_mode = #tpu.pipeline_mode<synchronous>, transform_indices = @transform_2, window_bounds = array<i64: 2, 16>}, {pipeline_mode = #tpu.pipeline_mode<synchronous>, transform_indices = @transform_3, window_bounds = array<i64: 16, 2>}, {pipeline_mode = #tpu.pipeline_mode<synchronous>, transform_indices = @transform_4, window_bounds = array<i64: 8, 32>}, {pipeline_mode = #tpu.pipeline_mode<synchronous>, transform_indices = @transform_5, window_bounds = array<i64: 1, 32>}, {pipeline_mode = #tpu.pipeline_mode<synchronous>, transform_indices = @transform_6, window_bounds = array<i64: 32, 32>}, {pipeline_mode = #tpu.pipeline_mode<synchronous>, transform_indices = @transform_7, window_bounds = array<i64: 1, 32>}, {pipeline_mode = #tpu.pipeline_mode<synchronous>, transform_indices = @transform_8, window_bounds = array<i64: 1, 32>}, {pipeline_mode = #tpu.pipeline_mode<synchronous>, transform_indices = @transform_9, window_bounds = array<i64: 1, 32>}, {pipeline_mode = #tpu.pipeline_mode<synchronous>, transform_indices = @transform_10, window_bounds = array<i64: 32, 32>}, {pipeline_mode = #tpu.pipeline_mode<synchronous>, transform_indices = @transform_11, window_bounds = array<i64: 1, 32>}, {pipeline_mode = #tpu.pipeline_mode<synchronous>, transform_indices = @transform_12, window_bounds = array<i64: 32, 32>}, {pipeline_mode = #tpu.pipeline_mode<synchronous>, transform_indices = @transform_13, window_bounds = array<i64: 1, 32>}, {pipeline_mode = #tpu.pipeline_mode<synchronous>, transform_indices = @transform_14, window_bounds = array<i64: 1, 32>}, {pipeline_mode = #tpu.pipeline_mode<synchronous>, transform_indices = @transform_15, window_bounds = array<i64: 1, 32>}, {pipeline_mode = #tpu.pipeline_mode<synchronous>, transform_indices = @transform_16, window_bounds = array<i64: 32, 32>}, {pipeline_mode = #tpu.pipeline_mode<synchronous>, transform_indices = @transform_17, window_bounds = array<i64: 1, 32>}, {pipeline_mode = #tpu.pipeline_mode<synchronous>, transform_indices = @transform_18, window_bounds = array<i64: 32, 32>}, {pipeline_mode = #tpu.pipeline_mode<synchronous>, transform_indices = @transform_19, window_bounds = array<i64: 1, 32>}, {pipeline_mode = #tpu.pipeline_mode<synchronous>, transform_indices = @transform_20, window_bounds = array<i64: 1, 32>}, {pipeline_mode = #tpu.pipeline_mode<synchronous>, transform_indices = @transform_21, window_bounds = array<i64: 1, 32>}, {pipeline_mode = #tpu.pipeline_mode<synchronous>, transform_indices = @transform_22, window_bounds = array<i64: 96, 192>}, {pipeline_mode = #tpu.pipeline_mode<synchronous>, transform_indices = @transform_23, window_bounds = array<i64: 1, 192>}, {pipeline_mode = #tpu.pipeline_mode<synchronous>, transform_indices = @transform_24, window_bounds = array<i64: 96, 96>}, {pipeline_mode = #tpu.pipeline_mode<synchronous>, transform_indices = @transform_25, window_bounds = array<i64: 1, 96>}, {pipeline_mode = #tpu.pipeline_mode<synchronous>, transform_indices = @transform_26, window_bounds = array<i64: 96, 96>}, {pipeline_mode = #tpu.pipeline_mode<synchronous>, transform_indices = @transform_27, window_bounds = array<i64: 1, 96>}, {pipeline_mode = #tpu.pipeline_mode<synchronous>, transform_indices = @transform_28, window_bounds = array<i64: 96, 192>}, {pipeline_mode = #tpu.pipeline_mode<synchronous>, transform_indices = @transform_29, window_bounds = array<i64: 1, 192>}, {pipeline_mode = #tpu.pipeline_mode<synchronous>, transform_indices = @transform_30, window_bounds = array<i64: 96, 96>}, {pipeline_mode = #tpu.pipeline_mode<synchronous>, transform_indices = @transform_31, window_bounds = array<i64: 1, 96>}, {pipeline_mode = #tpu.pipeline_mode<synchronous>, transform_indices = @transform_32, window_bounds = array<i64: 96, 96>}, {pipeline_mode = #tpu.pipeline_mode<synchronous>, transform_indices = @transform_33, window_bounds = array<i64: 1, 96>}, {pipeline_mode = #tpu.pipeline_mode<synchronous>, transform_indices = @transform_34, window_bounds = array<i64: 1, 1>}]} {
    %c0 = arith.constant 0 : index
    %c0_0 = arith.constant 0 : index
    %0 = vector.load %arg2[%c0, %c0_0] : memref<16x16xf32, #tpu.memory_space<vmem>>, vector<16x16xf32>
    %1 = arith.truncf %0 : vector<16x16xf32> to vector<16x16xbf16>
    %c0_1 = arith.constant 0 : index
    %c0_2 = arith.constant 0 : index
    %2 = vector.load %arg1[%c0_1, %c0_2] : memref<16x8xf32, #tpu.memory_space<vmem>>, vector<16x8xf32>
    %c0_3 = arith.constant 0 : index
    %c0_4 = arith.constant 0 : index
    %3 = vector.load %arg5[%c0_3, %c0_4] : memref<8x32xf32, #tpu.memory_space<vmem>>, vector<8x32xf32>
    %c0_5 = arith.constant 0 : index
    %c0_6 = arith.constant 0 : index
    %4 = vector.load %arg6[%c0_5, %c0_6] : memref<1x32xf32, #tpu.memory_space<vmem>>, vector<1x32xf32>
    %c0_7 = arith.constant 0 : index
    %c0_8 = arith.constant 0 : index
    %5 = vector.load %arg7[%c0_7, %c0_8] : memref<32x32xf32, #tpu.memory_space<vmem>>, vector<32x32xf32>
    %c0_9 = arith.constant 0 : index
    %c0_10 = arith.constant 0 : index
    %6 = vector.load %arg8[%c0_9, %c0_10] : memref<1x32xf32, #tpu.memory_space<vmem>>, vector<1x32xf32>
    %c0_11 = arith.constant 0 : index
    %c0_12 = arith.constant 0 : index
    %7 = vector.load %arg9[%c0_11, %c0_12] : memref<1x32xf32, #tpu.memory_space<vmem>>, vector<1x32xf32>
    %c0_13 = arith.constant 0 : index
    %c0_14 = arith.constant 0 : index
    %8 = vector.load %arg10[%c0_13, %c0_14] : memref<1x32xf32, #tpu.memory_space<vmem>>, vector<1x32xf32>
    %9 = arith.truncf %2 : vector<16x8xf32> to vector<16x8xbf16>
    %cst = arith.constant dense<0.000000e+00> : vector<16x8xf32>
    %10 = tpu.matmul %1, %9, %cst {dimension_numbers = #tpu.dot_dimension_numbers<[1], [0], [0], [1], [0, 0, 1, 1], [], []>} : vector<16x16xbf16>, vector<16x8xbf16>, vector<16x8xf32> -> vector<16x8xf32>
    %11 = arith.addf %2, %10 : vector<16x8xf32>
    %12 = arith.truncf %11 : vector<16x8xf32> to vector<16x8xbf16>
    %13 = arith.truncf %3 : vector<8x32xf32> to vector<8x32xbf16>
    %cst_15 = arith.constant dense<0.000000e+00> : vector<16x32xf32>
    %14 = tpu.matmul %12, %13, %cst_15 {dimension_numbers = #tpu.dot_dimension_numbers<[1], [0], [0], [1], [0, 0, 1, 1], [], []>} : vector<16x8xbf16>, vector<8x32xbf16>, vector<16x32xf32> -> vector<16x32xf32>
    %15 = vector.broadcast %4 : vector<1x32xf32> to vector<16x32xf32>
    %16 = arith.addf %14, %15 : vector<16x32xf32>
    %cst_16 = arith.constant 0.000000e+00 : f32
    %17 = vector.broadcast %cst_16 : f32 to vector<16x32xf32>
    %18 = arith.maximumf %16, %17 : vector<16x32xf32>
    %19 = arith.truncf %18 : vector<16x32xf32> to vector<16x32xbf16>
    %20 = arith.truncf %5 : vector<32x32xf32> to vector<32x32xbf16>
    %cst_17 = arith.constant dense<0.000000e+00> : vector<16x32xf32>
    %21 = tpu.matmul %19, %20, %cst_17 {dimension_numbers = #tpu.dot_dimension_numbers<[1], [0], [0], [1], [0, 0, 1, 1], [], []>} : vector<16x32xbf16>, vector<32x32xbf16>, vector<16x32xf32> -> vector<16x32xf32>
    %22 = vector.broadcast %6 : vector<1x32xf32> to vector<16x32xf32>
    %23 = arith.addf %21, %22 : vector<16x32xf32>
    %cst_18 = arith.constant 0.000000e+00 : f32
    %24 = vector.broadcast %cst_18 : f32 to vector<16x32xf32>
    %25 = arith.maximumf %23, %24 : vector<16x32xf32>
    %cst_19 = arith.constant dense<0.000000e+00> : vector<32xf32>
    %26 = vector.multi_reduction <add>, %25, %cst_19 [0] : vector<16x32xf32> to vector<32xf32>
    %27 = vector.shape_cast %26 : vector<32xf32> to vector<1x32xf32>
    %28 = arith.mulf %25, %25 : vector<16x32xf32>
    %cst_20 = arith.constant dense<0.000000e+00> : vector<32xf32>
    %29 = vector.multi_reduction <add>, %28, %cst_20 [0] : vector<16x32xf32> to vector<32xf32>
    %30 = vector.shape_cast %29 : vector<32xf32> to vector<1x32xf32>
    %cst_21 = arith.constant 6.250000e-02 : f32
    %31 = vector.broadcast %cst_21 : f32 to vector<1x32xf32>
    %32 = arith.mulf %27, %31 : vector<1x32xf32>
    %cst_22 = arith.constant 6.250000e-02 : f32
    %33 = vector.broadcast %cst_22 : f32 to vector<1x32xf32>
    %34 = arith.mulf %30, %33 : vector<1x32xf32>
    %35 = arith.mulf %32, %32 : vector<1x32xf32>
    %36 = arith.subf %34, %35 : vector<1x32xf32>
    %cst_23 = arith.constant 0.000000e+00 : f32
    %37 = vector.broadcast %cst_23 : f32 to vector<1x32xf32>
    %38 = arith.maximumf %36, %37 : vector<1x32xf32>
    %cst_24 = arith.constant 9.99999974E-6 : f32
    %39 = vector.broadcast %cst_24 : f32 to vector<1x32xf32>
    %40 = arith.addf %38, %39 : vector<1x32xf32>
    %41 = math.rsqrt %40 : vector<1x32xf32>
    %42 = vector.broadcast %32 : vector<1x32xf32> to vector<16x32xf32>
    %43 = arith.subf %25, %42 : vector<16x32xf32>
    %44 = vector.broadcast %7 : vector<1x32xf32> to vector<16x32xf32>
    %45 = arith.mulf %44, %43 : vector<16x32xf32>
    %46 = vector.broadcast %41 : vector<1x32xf32> to vector<16x32xf32>
    %47 = arith.mulf %45, %46 : vector<16x32xf32>
    %48 = vector.broadcast %8 : vector<1x32xf32> to vector<16x32xf32>
    %49 = arith.addf %47, %48 : vector<16x32xf32>
    %c0_25 = arith.constant 0 : index
    %c0_26 = arith.constant 0 : index
    %50 = vector.load %arg36[%c0_25, %c0_26] : memref<16x96xf32, #tpu.memory_space<vmem>>, vector<16x32xf32>
    tpu.vector_store %arg36[%c0_25, %c0_26], %49 {strides = array<i32>} : memref<16x96xf32, #tpu.memory_space<vmem>>, vector<16x32xf32>,
    %c0_27 = arith.constant 0 : index
    %c0_28 = arith.constant 0 : index
    %51 = vector.load %arg11[%c0_27, %c0_28] : memref<32x32xf32, #tpu.memory_space<vmem>>, vector<32x32xf32>
    %c0_29 = arith.constant 0 : index
    %c0_30 = arith.constant 0 : index
    %52 = vector.load %arg12[%c0_29, %c0_30] : memref<1x32xf32, #tpu.memory_space<vmem>>, vector<1x32xf32>
    %c0_31 = arith.constant 0 : index
    %c0_32 = arith.constant 0 : index
    %53 = vector.load %arg13[%c0_31, %c0_32] : memref<32x32xf32, #tpu.memory_space<vmem>>, vector<32x32xf32>
    %c0_33 = arith.constant 0 : index
    %c0_34 = arith.constant 0 : index
    %54 = vector.load %arg14[%c0_33, %c0_34] : memref<1x32xf32, #tpu.memory_space<vmem>>, vector<1x32xf32>
    %c0_35 = arith.constant 0 : index
    %c0_36 = arith.constant 0 : index
    %55 = vector.load %arg15[%c0_35, %c0_36] : memref<1x32xf32, #tpu.memory_space<vmem>>, vector<1x32xf32>
    %c0_37 = arith.constant 0 : index
    %c0_38 = arith.constant 0 : index
    %56 = vector.load %arg16[%c0_37, %c0_38] : memref<1x32xf32, #tpu.memory_space<vmem>>, vector<1x32xf32>
    %57 = arith.truncf %49 : vector<16x32xf32> to vector<16x32xbf16>
    %cst_39 = arith.constant dense<0.000000e+00> : vector<16x32xf32>
    %58 = tpu.matmul %1, %57, %cst_39 {dimension_numbers = #tpu.dot_dimension_numbers<[1], [0], [0], [1], [0, 0, 1, 1], [], []>} : vector<16x16xbf16>, vector<16x32xbf16>, vector<16x32xf32> -> vector<16x32xf32>
    %59 = arith.addf %49, %58 : vector<16x32xf32>
    %60 = arith.truncf %59 : vector<16x32xf32> to vector<16x32xbf16>
    %61 = arith.truncf %51 : vector<32x32xf32> to vector<32x32xbf16>
    %cst_40 = arith.constant dense<0.000000e+00> : vector<16x32xf32>
    %62 = tpu.matmul %60, %61, %cst_40 {dimension_numbers = #tpu.dot_dimension_numbers<[1], [0], [0], [1], [0, 0, 1, 1], [], []>} : vector<16x32xbf16>, vector<32x32xbf16>, vector<16x32xf32> -> vector<16x32xf32>
    %63 = vector.broadcast %52 : vector<1x32xf32> to vector<16x32xf32>
    %64 = arith.addf %62, %63 : vector<16x32xf32>
    %cst_41 = arith.constant 0.000000e+00 : f32
    %65 = vector.broadcast %cst_41 : f32 to vector<16x32xf32>
    %66 = arith.maximumf %64, %65 : vector<16x32xf32>
    %67 = arith.truncf %66 : vector<16x32xf32> to vector<16x32xbf16>
    %68 = arith.truncf %53 : vector<32x32xf32> to vector<32x32xbf16>
    %cst_42 = arith.constant dense<0.000000e+00> : vector<16x32xf32>
    %69 = tpu.matmul %67, %68, %cst_42 {dimension_numbers = #tpu.dot_dimension_numbers<[1], [0], [0], [1], [0, 0, 1, 1], [], []>} : vector<16x32xbf16>, vector<32x32xbf16>, vector<16x32xf32> -> vector<16x32xf32>
    %70 = vector.broadcast %54 : vector<1x32xf32> to vector<16x32xf32>
    %71 = arith.addf %69, %70 : vector<16x32xf32>
    %cst_43 = arith.constant 0.000000e+00 : f32
    %72 = vector.broadcast %cst_43 : f32 to vector<16x32xf32>
    %73 = arith.maximumf %71, %72 : vector<16x32xf32>
    %cst_44 = arith.constant dense<0.000000e+00> : vector<32xf32>
    %74 = vector.multi_reduction <add>, %73, %cst_44 [0] : vector<16x32xf32> to vector<32xf32>
    %75 = vector.shape_cast %74 : vector<32xf32> to vector<1x32xf32>
    %76 = arith.mulf %73, %73 : vector<16x32xf32>
    %cst_45 = arith.constant dense<0.000000e+00> : vector<32xf32>
    %77 = vector.multi_reduction <add>, %76, %cst_45 [0] : vector<16x32xf32> to vector<32xf32>
    %78 = vector.shape_cast %77 : vector<32xf32> to vector<1x32xf32>
    %cst_46 = arith.constant 6.250000e-02 : f32
    %79 = vector.broadcast %cst_46 : f32 to vector<1x32xf32>
    %80 = arith.mulf %75, %79 : vector<1x32xf32>
    %cst_47 = arith.constant 6.250000e-02 : f32
    %81 = vector.broadcast %cst_47 : f32 to vector<1x32xf32>
    %82 = arith.mulf %78, %81 : vector<1x32xf32>
    %83 = arith.mulf %80, %80 : vector<1x32xf32>
    %84 = arith.subf %82, %83 : vector<1x32xf32>
    %cst_48 = arith.constant 0.000000e+00 : f32
    %85 = vector.broadcast %cst_48 : f32 to vector<1x32xf32>
    %86 = arith.maximumf %84, %85 : vector<1x32xf32>
    %cst_49 = arith.constant 9.99999974E-6 : f32
    %87 = vector.broadcast %cst_49 : f32 to vector<1x32xf32>
    %88 = arith.addf %86, %87 : vector<1x32xf32>
    %89 = math.rsqrt %88 : vector<1x32xf32>
    %90 = vector.broadcast %80 : vector<1x32xf32> to vector<16x32xf32>
    %91 = arith.subf %73, %90 : vector<16x32xf32>
    %92 = vector.broadcast %55 : vector<1x32xf32> to vector<16x32xf32>
    %93 = arith.mulf %92, %91 : vector<16x32xf32>
    %94 = vector.broadcast %89 : vector<1x32xf32> to vector<16x32xf32>
    %95 = arith.mulf %93, %94 : vector<16x32xf32>
    %96 = vector.broadcast %56 : vector<1x32xf32> to vector<16x32xf32>
    %97 = arith.addf %95, %96 : vector<16x32xf32>
    %c0_50 = arith.constant 0 : index
    %c32 = arith.constant 32 : index
    %98 = vector.load %arg36[%c0_50, %c32] : memref<16x96xf32, #tpu.memory_space<vmem>>, vector<16x32xf32>
    tpu.vector_store %arg36[%c0_50, %c32], %97 {strides = array<i32>} : memref<16x96xf32, #tpu.memory_space<vmem>>, vector<16x32xf32>,
    %c0_51 = arith.constant 0 : index
    %c0_52 = arith.constant 0 : index
    %99 = vector.load %arg17[%c0_51, %c0_52] : memref<32x32xf32, #tpu.memory_space<vmem>>, vector<32x32xf32>
    %c0_53 = arith.constant 0 : index
    %c0_54 = arith.constant 0 : index
    %100 = vector.load %arg18[%c0_53, %c0_54] : memref<1x32xf32, #tpu.memory_space<vmem>>, vector<1x32xf32>
    %c0_55 = arith.constant 0 : index
    %c0_56 = arith.constant 0 : index
    %101 = vector.load %arg19[%c0_55, %c0_56] : memref<32x32xf32, #tpu.memory_space<vmem>>, vector<32x32xf32>
    %c0_57 = arith.constant 0 : index
    %c0_58 = arith.constant 0 : index
    %102 = vector.load %arg20[%c0_57, %c0_58] : memref<1x32xf32, #tpu.memory_space<vmem>>, vector<1x32xf32>
    %c0_59 = arith.constant 0 : index
    %c0_60 = arith.constant 0 : index
    %103 = vector.load %arg21[%c0_59, %c0_60] : memref<1x32xf32, #tpu.memory_space<vmem>>, vector<1x32xf32>
    %c0_61 = arith.constant 0 : index
    %c0_62 = arith.constant 0 : index
    %104 = vector.load %arg22[%c0_61, %c0_62] : memref<1x32xf32, #tpu.memory_space<vmem>>, vector<1x32xf32>
    %105 = arith.truncf %97 : vector<16x32xf32> to vector<16x32xbf16>
    %cst_63 = arith.constant dense<0.000000e+00> : vector<16x32xf32>
    %106 = tpu.matmul %1, %105, %cst_63 {dimension_numbers = #tpu.dot_dimension_numbers<[1], [0], [0], [1], [0, 0, 1, 1], [], []>} : vector<16x16xbf16>, vector<16x32xbf16>, vector<16x32xf32> -> vector<16x32xf32>
    %107 = arith.addf %97, %106 : vector<16x32xf32>
    %108 = arith.truncf %107 : vector<16x32xf32> to vector<16x32xbf16>
    %109 = arith.truncf %99 : vector<32x32xf32> to vector<32x32xbf16>
    %cst_64 = arith.constant dense<0.000000e+00> : vector<16x32xf32>
    %110 = tpu.matmul %108, %109, %cst_64 {dimension_numbers = #tpu.dot_dimension_numbers<[1], [0], [0], [1], [0, 0, 1, 1], [], []>} : vector<16x32xbf16>, vector<32x32xbf16>, vector<16x32xf32> -> vector<16x32xf32>
    %111 = vector.broadcast %100 : vector<1x32xf32> to vector<16x32xf32>
    %112 = arith.addf %110, %111 : vector<16x32xf32>
    %cst_65 = arith.constant 0.000000e+00 : f32
    %113 = vector.broadcast %cst_65 : f32 to vector<16x32xf32>
    %114 = arith.maximumf %112, %113 : vector<16x32xf32>
    %115 = arith.truncf %114 : vector<16x32xf32> to vector<16x32xbf16>
    %116 = arith.truncf %101 : vector<32x32xf32> to vector<32x32xbf16>
    %cst_66 = arith.constant dense<0.000000e+00> : vector<16x32xf32>
    %117 = tpu.matmul %115, %116, %cst_66 {dimension_numbers = #tpu.dot_dimension_numbers<[1], [0], [0], [1], [0, 0, 1, 1], [], []>} : vector<16x32xbf16>, vector<32x32xbf16>, vector<16x32xf32> -> vector<16x32xf32>
    %118 = vector.broadcast %102 : vector<1x32xf32> to vector<16x32xf32>
    %119 = arith.addf %117, %118 : vector<16x32xf32>
    %cst_67 = arith.constant 0.000000e+00 : f32
    %120 = vector.broadcast %cst_67 : f32 to vector<16x32xf32>
    %121 = arith.maximumf %119, %120 : vector<16x32xf32>
    %cst_68 = arith.constant dense<0.000000e+00> : vector<32xf32>
    %122 = vector.multi_reduction <add>, %121, %cst_68 [0] : vector<16x32xf32> to vector<32xf32>
    %123 = vector.shape_cast %122 : vector<32xf32> to vector<1x32xf32>
    %124 = arith.mulf %121, %121 : vector<16x32xf32>
    %cst_69 = arith.constant dense<0.000000e+00> : vector<32xf32>
    %125 = vector.multi_reduction <add>, %124, %cst_69 [0] : vector<16x32xf32> to vector<32xf32>
    %126 = vector.shape_cast %125 : vector<32xf32> to vector<1x32xf32>
    %cst_70 = arith.constant 6.250000e-02 : f32
    %127 = vector.broadcast %cst_70 : f32 to vector<1x32xf32>
    %128 = arith.mulf %123, %127 : vector<1x32xf32>
    %cst_71 = arith.constant 6.250000e-02 : f32
    %129 = vector.broadcast %cst_71 : f32 to vector<1x32xf32>
    %130 = arith.mulf %126, %129 : vector<1x32xf32>
    %131 = arith.mulf %128, %128 : vector<1x32xf32>
    %132 = arith.subf %130, %131 : vector<1x32xf32>
    %cst_72 = arith.constant 0.000000e+00 : f32
    %133 = vector.broadcast %cst_72 : f32 to vector<1x32xf32>
    %134 = arith.maximumf %132, %133 : vector<1x32xf32>
    %cst_73 = arith.constant 9.99999974E-6 : f32
    %135 = vector.broadcast %cst_73 : f32 to vector<1x32xf32>
    %136 = arith.addf %134, %135 : vector<1x32xf32>
    %137 = math.rsqrt %136 : vector<1x32xf32>
    %138 = vector.broadcast %128 : vector<1x32xf32> to vector<16x32xf32>
    %139 = arith.subf %121, %138 : vector<16x32xf32>
    %140 = vector.broadcast %103 : vector<1x32xf32> to vector<16x32xf32>
    %141 = arith.mulf %140, %139 : vector<16x32xf32>
    %142 = vector.broadcast %137 : vector<1x32xf32> to vector<16x32xf32>
    %143 = arith.mulf %141, %142 : vector<16x32xf32>
    %144 = vector.broadcast %104 : vector<1x32xf32> to vector<16x32xf32>
    %145 = arith.addf %143, %144 : vector<16x32xf32>
    %c0_74 = arith.constant 0 : index
    %c64 = arith.constant 64 : index
    %146 = vector.load %arg36[%c0_74, %c64] : memref<16x96xf32, #tpu.memory_space<vmem>>, vector<16x32xf32>
    tpu.vector_store %arg36[%c0_74, %c64], %145 {strides = array<i32>} : memref<16x96xf32, #tpu.memory_space<vmem>>, vector<16x32xf32>,
    %c0_75 = arith.constant 0 : index
    %c0_76 = arith.constant 0 : index
    %147 = vector.load %arg36[%c0_75, %c0_76] : memref<16x96xf32, #tpu.memory_space<vmem>>, vector<16x96xf32>
    %c0_77 = arith.constant 0 : index
    %c0_78 = arith.constant 0 : index
    %148 = vector.load %arg3[%c0_77, %c0_78] : memref<2x16xf32, #tpu.memory_space<vmem>>, vector<2x16xf32>
    %149 = arith.truncf %148 : vector<2x16xf32> to vector<2x16xbf16>
    %150 = arith.truncf %147 : vector<16x96xf32> to vector<16x96xbf16>
    %cst_79 = arith.constant dense<0.000000e+00> : vector<2x96xf32>
    %151 = tpu.matmul %149, %150, %cst_79 {dimension_numbers = #tpu.dot_dimension_numbers<[1], [0], [0], [1], [0, 0, 1, 1], [], []>} : vector<2x16xbf16>, vector<16x96xbf16>, vector<2x96xf32> -> vector<2x96xf32>
    %c0_80 = arith.constant 0 : index
    %c0_81 = arith.constant 0 : index
    %152 = vector.load %arg23[%c0_80, %c0_81] : memref<96x192xf32, #tpu.memory_space<vmem>>, vector<96x192xf32>
    %c0_82 = arith.constant 0 : index
    %c0_83 = arith.constant 0 : index
    %153 = vector.load %arg24[%c0_82, %c0_83] : memref<1x192xf32, #tpu.memory_space<vmem>>, vector<1x192xf32>
    %c0_84 = arith.constant 0 : index
    %c0_85 = arith.constant 0 : index
    %154 = vector.load %arg25[%c0_84, %c0_85] : memref<96x96xf32, #tpu.memory_space<vmem>>, vector<96x96xf32>
    %c0_86 = arith.constant 0 : index
    %c0_87 = arith.constant 0 : index
    %155 = vector.load %arg26[%c0_86, %c0_87] : memref<1x96xf32, #tpu.memory_space<vmem>>, vector<1x96xf32>
    %c0_88 = arith.constant 0 : index
    %c0_89 = arith.constant 0 : index
    %156 = vector.load %arg27[%c0_88, %c0_89] : memref<96x96xf32, #tpu.memory_space<vmem>>, vector<96x96xf32>
    %c0_90 = arith.constant 0 : index
    %c0_91 = arith.constant 0 : index
    %157 = vector.load %arg28[%c0_90, %c0_91] : memref<1x96xf32, #tpu.memory_space<vmem>>, vector<1x96xf32>
    %c0_92 = arith.constant 0 : index
    %c0_93 = arith.constant 0 : index
    %158 = vector.load %arg29[%c0_92, %c0_93] : memref<96x192xf32, #tpu.memory_space<vmem>>, vector<96x192xf32>
    %c0_94 = arith.constant 0 : index
    %c0_95 = arith.constant 0 : index
    %159 = vector.load %arg30[%c0_94, %c0_95] : memref<1x192xf32, #tpu.memory_space<vmem>>, vector<1x192xf32>
    %c0_96 = arith.constant 0 : index
    %c0_97 = arith.constant 0 : index
    %160 = vector.load %arg31[%c0_96, %c0_97] : memref<96x96xf32, #tpu.memory_space<vmem>>, vector<96x96xf32>
    %c0_98 = arith.constant 0 : index
    %c0_99 = arith.constant 0 : index
    %161 = vector.load %arg32[%c0_98, %c0_99] : memref<1x96xf32, #tpu.memory_space<vmem>>, vector<1x96xf32>
    %c0_100 = arith.constant 0 : index
    %c0_101 = arith.constant 0 : index
    %162 = vector.load %arg33[%c0_100, %c0_101] : memref<96x96xf32, #tpu.memory_space<vmem>>, vector<96x96xf32>
    %c0_102 = arith.constant 0 : index
    %c0_103 = arith.constant 0 : index
    %163 = vector.load %arg34[%c0_102, %c0_103] : memref<1x96xf32, #tpu.memory_space<vmem>>, vector<1x96xf32>
    %164 = arith.truncf %151 : vector<2x96xf32> to vector<2x96xbf16>
    %165 = arith.truncf %152 : vector<96x192xf32> to vector<96x192xbf16>
    %cst_104 = arith.constant dense<0.000000e+00> : vector<2x192xf32>
    %166 = tpu.matmul %164, %165, %cst_104 {dimension_numbers = #tpu.dot_dimension_numbers<[1], [0], [0], [1], [0, 0, 1, 1], [], []>} : vector<2x96xbf16>, vector<96x192xbf16>, vector<2x192xf32> -> vector<2x192xf32>
    %167 = vector.broadcast %153 : vector<1x192xf32> to vector<2x192xf32>
    %168 = arith.addf %166, %167 : vector<2x192xf32>
    %169 = vector.extract_strided_slice %168 {offsets = [0, 0], sizes = [2, 96], strides = [1, 1]} : vector<2x192xf32> to vector<2x96xf32>
    %cst_105 = arith.constant 0.000000e+00 : f32
    %170 = vector.broadcast %cst_105 : f32 to vector<2x96xf32>
    %171 = arith.maximumf %169, %170 : vector<2x96xf32>
    %172 = vector.extract_strided_slice %168 {offsets = [0, 96], sizes = [2, 96], strides = [1, 1]} : vector<2x192xf32> to vector<2x96xf32>
    %173 = arith.truncf %171 : vector<2x96xf32> to vector<2x96xbf16>
    %174 = arith.truncf %154 : vector<96x96xf32> to vector<96x96xbf16>
    %cst_106 = arith.constant dense<0.000000e+00> : vector<2x96xf32>
    %175 = tpu.matmul %173, %174, %cst_106 {dimension_numbers = #tpu.dot_dimension_numbers<[1], [0], [0], [1], [0, 0, 1, 1], [], []>} : vector<2x96xbf16>, vector<96x96xbf16>, vector<2x96xf32> -> vector<2x96xf32>
    %176 = vector.broadcast %155 : vector<1x96xf32> to vector<2x96xf32>
    %177 = arith.addf %175, %176 : vector<2x96xf32>
    %cst_107 = arith.constant 0.000000e+00 : f32
    %178 = vector.broadcast %cst_107 : f32 to vector<2x96xf32>
    %179 = arith.maximumf %177, %178 : vector<2x96xf32>
    %180 = arith.truncf %179 : vector<2x96xf32> to vector<2x96xbf16>
    %181 = arith.truncf %156 : vector<96x96xf32> to vector<96x96xbf16>
    %cst_108 = arith.constant dense<0.000000e+00> : vector<2x96xf32>
    %182 = tpu.matmul %180, %181, %cst_108 {dimension_numbers = #tpu.dot_dimension_numbers<[1], [0], [0], [1], [0, 0, 1, 1], [], []>} : vector<2x96xbf16>, vector<96x96xbf16>, vector<2x96xf32> -> vector<2x96xf32>
    %183 = vector.broadcast %157 : vector<1x96xf32> to vector<2x96xf32>
    %184 = arith.addf %182, %183 : vector<2x96xf32>
    %cst_109 = arith.constant 0.000000e+00 : f32
    %185 = vector.broadcast %cst_109 : f32 to vector<2x96xf32>
    %186 = arith.maximumf %184, %185 : vector<2x96xf32>
    %187 = arith.addf %186, %172 : vector<2x96xf32>
    %188 = arith.truncf %147 : vector<16x96xf32> to vector<16x96xbf16>
    %189 = arith.truncf %158 : vector<96x192xf32> to vector<96x192xbf16>
    %cst_110 = arith.constant dense<0.000000e+00> : vector<16x192xf32>
    %190 = tpu.matmul %188, %189, %cst_110 {dimension_numbers = #tpu.dot_dimension_numbers<[1], [0], [0], [1], [0, 0, 1, 1], [], []>} : vector<16x96xbf16>, vector<96x192xbf16>, vector<16x192xf32> -> vector<16x192xf32>
    %191 = vector.broadcast %159 : vector<1x192xf32> to vector<16x192xf32>
    %192 = arith.addf %190, %191 : vector<16x192xf32>
    %193 = vector.extract_strided_slice %192 {offsets = [0, 0], sizes = [16, 96], strides = [1, 1]} : vector<16x192xf32> to vector<16x96xf32>
    %cst_111 = arith.constant 0.000000e+00 : f32
    %194 = vector.broadcast %cst_111 : f32 to vector<16x96xf32>
    %195 = arith.maximumf %193, %194 : vector<16x96xf32>
    %196 = vector.extract_strided_slice %192 {offsets = [0, 96], sizes = [16, 96], strides = [1, 1]} : vector<16x192xf32> to vector<16x96xf32>
    %197 = arith.truncf %195 : vector<16x96xf32> to vector<16x96xbf16>
    %198 = arith.truncf %160 : vector<96x96xf32> to vector<96x96xbf16>
    %cst_112 = arith.constant dense<0.000000e+00> : vector<16x96xf32>
    %199 = tpu.matmul %197, %198, %cst_112 {dimension_numbers = #tpu.dot_dimension_numbers<[1], [0], [0], [1], [0, 0, 1, 1], [], []>} : vector<16x96xbf16>, vector<96x96xbf16>, vector<16x96xf32> -> vector<16x96xf32>
    %200 = vector.broadcast %161 : vector<1x96xf32> to vector<16x96xf32>
    %201 = arith.addf %199, %200 : vector<16x96xf32>
    %cst_113 = arith.constant 0.000000e+00 : f32
    %202 = vector.broadcast %cst_113 : f32 to vector<16x96xf32>
    %203 = arith.maximumf %201, %202 : vector<16x96xf32>
    %204 = arith.truncf %203 : vector<16x96xf32> to vector<16x96xbf16>
    %205 = arith.truncf %162 : vector<96x96xf32> to vector<96x96xbf16>
    %cst_114 = arith.constant dense<0.000000e+00> : vector<16x96xf32>
    %206 = tpu.matmul %204, %205, %cst_114 {dimension_numbers = #tpu.dot_dimension_numbers<[1], [0], [0], [1], [0, 0, 1, 1], [], []>} : vector<16x96xbf16>, vector<96x96xbf16>, vector<16x96xf32> -> vector<16x96xf32>
    %207 = vector.broadcast %163 : vector<1x96xf32> to vector<16x96xf32>
    %208 = arith.addf %206, %207 : vector<16x96xf32>
    %cst_115 = arith.constant 0.000000e+00 : f32
    %209 = vector.broadcast %cst_115 : f32 to vector<16x96xf32>
    %210 = arith.maximumf %208, %209 : vector<16x96xf32>
    %211 = arith.addf %210, %196 : vector<16x96xf32>
    %212 = arith.truncf %211 : vector<16x96xf32> to vector<16x96xbf16>
    %213 = arith.truncf %187 : vector<2x96xf32> to vector<2x96xbf16>
    %cst_116 = arith.constant dense<0.000000e+00> : vector<16x2xf32>
    %214 = tpu.matmul %212, %213, %cst_116 {dimension_numbers = #tpu.dot_dimension_numbers<[1], [1], [0], [0], [0, 0, 1, 0], [], []>} : vector<16x96xbf16>, vector<2x96xbf16>, vector<16x2xf32> -> vector<16x2xf32>
    %c0_117 = arith.constant 0 : index
    %c0_118 = arith.constant 0 : index
    %215 = vector.load %arg4[%c0_117, %c0_118] : memref<16x2xf32, #tpu.memory_space<vmem>>, vector<16x2xf32>
    %cst_119 = arith.constant 1.000000e+00 : f32
    %216 = vector.broadcast %cst_119 : f32 to vector<16x2xf32>
    %217 = arith.subf %216, %215 : vector<16x2xf32>
    %218 = arith.mulf %214, %215 : vector<16x2xf32>
    %219 = arith.mulf %214, %217 : vector<16x2xf32>
    %cst_120 = arith.constant 0.000000e+00 : f32
    %220 = vector.broadcast %cst_120 : f32 to vector<16x2xf32>
    %221 = arith.subf %220, %218 : vector<16x2xf32>
    %cst_121 = arith.constant 0.000000e+00 : f32
    %222 = vector.broadcast %cst_121 : f32 to vector<16x2xf32>
    %223 = arith.maximumf %221, %222 : vector<16x2xf32>
    %224 = math.absf %221 : vector<16x2xf32>
    %cst_122 = arith.constant 0.000000e+00 : f32
    %225 = vector.broadcast %cst_122 : f32 to vector<16x2xf32>
    %226 = arith.subf %225, %224 : vector<16x2xf32>
    %227 = math.exp %226 : vector<16x2xf32>
    %228 = math.log1p %227 : vector<16x2xf32>
    %229 = arith.addf %223, %228 : vector<16x2xf32>
    %cst_123 = arith.constant 0.693147182 : f32
    %230 = vector.broadcast %cst_123 : f32 to vector<16x2xf32>
    %231 = arith.subf %230, %229 : vector<16x2xf32>
    %232 = vector.shape_cast %231 : vector<16x2xf32> to vector<1x16x2xf32>
    %cst_124 = arith.constant dense<0.000000e+00> : vector<1xf32>
    %233 = vector.multi_reduction <add>, %232, %cst_124 [1, 2] : vector<1x16x2xf32> to vector<1xf32>
    %234 = vector.shape_cast %233 : vector<1xf32> to vector<1x1x1xf32>
    %235 = vector.extract %234[0, 0, 0] : f32 from vector<1x1x1xf32>
    %cst_125 = arith.constant 1.600000e+01 : f32
    %236 = arith.divf %235, %cst_125 : f32
    %cst_126 = arith.constant 0.000000e+00 : f32
    %237 = vector.broadcast %cst_126 : f32 to vector<16x2xf32>
    %238 = arith.subf %237, %219 : vector<16x2xf32>
    %cst_127 = arith.constant 0.000000e+00 : f32
    %239 = vector.broadcast %cst_127 : f32 to vector<16x2xf32>
    %240 = arith.maximumf %238, %239 : vector<16x2xf32>
    %241 = math.absf %238 : vector<16x2xf32>
    %cst_128 = arith.constant 0.000000e+00 : f32
    %242 = vector.broadcast %cst_128 : f32 to vector<16x2xf32>
    %243 = arith.subf %242, %241 : vector<16x2xf32>
    %244 = math.exp %243 : vector<16x2xf32>
    %245 = math.log1p %244 : vector<16x2xf32>
    %246 = arith.addf %240, %245 : vector<16x2xf32>
    %247 = arith.addf %246, %219 : vector<16x2xf32>
    %cst_129 = arith.constant 0.693147182 : f32
    %248 = vector.broadcast %cst_129 : f32 to vector<16x2xf32>
    %249 = arith.subf %247, %248 : vector<16x2xf32>
    %250 = vector.shape_cast %249 : vector<16x2xf32> to vector<1x16x2xf32>
    %cst_130 = arith.constant dense<0.000000e+00> : vector<1xf32>
    %251 = vector.multi_reduction <add>, %250, %cst_130 [1, 2] : vector<1x16x2xf32> to vector<1xf32>
    %252 = vector.shape_cast %251 : vector<1xf32> to vector<1x1x1xf32>
    %253 = vector.extract %252[0, 0, 0] : f32 from vector<1x1x1xf32>
    %cst_131 = arith.constant 1.600000e+01 : f32
    %254 = arith.divf %253, %cst_131 : f32
    %255 = arith.subf %254, %236 : f32
    %256 = vector.broadcast %255 : f32 to vector<1x1xf32>
    %c0_132 = arith.constant 0 : index
    %c0_133 = arith.constant 0 : index
    %257 = vector.load %arg35[%c0_132, %c0_133] : memref<1x1xf32, #tpu.memory_space<vmem>>, vector<1x1xf32>
    tpu.vector_store %arg35[%c0_132, %c0_133], %256 {strides = array<i32>} : memref<1x1xf32, #tpu.memory_space<vmem>>, vector<1x1xf32>,
    return
  }
  func.func @transform_0(%arg0: i32) -> (i32, i32) {
    %c0_i32 = arith.constant 0 : i32
    %c0_i32_0 = arith.constant 0 : i32
    %c0_i32_1 = arith.constant 0 : i32
    return %c0_i32, %c0_i32_0 : i32, i32
  }
  func.func @transform_1(%arg0: i32) -> (i32, i32) {
    %c0_i32 = arith.constant 0 : i32
    %c0_i32_0 = arith.constant 0 : i32
    %c0_i32_1 = arith.constant 0 : i32
    return %c0_i32, %c0_i32_0 : i32, i32
  }
  func.func @transform_2(%arg0: i32) -> (i32, i32) {
    %c0_i32 = arith.constant 0 : i32
    %c0_i32_0 = arith.constant 0 : i32
    %c0_i32_1 = arith.constant 0 : i32
    return %c0_i32, %c0_i32_0 : i32, i32
  }
  func.func @transform_3(%arg0: i32) -> (i32, i32) {
    %c0_i32 = arith.constant 0 : i32
    %c0_i32_0 = arith.constant 0 : i32
    %c0_i32_1 = arith.constant 0 : i32
    return %c0_i32, %c0_i32_0 : i32, i32
  }
  func.func @transform_4(%arg0: i32) -> (i32, i32) {
    %c0_i32 = arith.constant 0 : i32
    %c0_i32_0 = arith.constant 0 : i32
    %c0_i32_1 = arith.constant 0 : i32
    return %c0_i32, %c0_i32_0 : i32, i32
  }
  func.func @transform_5(%arg0: i32) -> (i32, i32) {
    %c0_i32 = arith.constant 0 : i32
    %c0_i32_0 = arith.constant 0 : i32
    %c0_i32_1 = arith.constant 0 : i32
    return %c0_i32, %c0_i32_0 : i32, i32
  }
  func.func @transform_6(%arg0: i32) -> (i32, i32) {
    %c0_i32 = arith.constant 0 : i32
    %c0_i32_0 = arith.constant 0 : i32
    %c0_i32_1 = arith.constant 0 : i32
    return %c0_i32, %c0_i32_0 : i32, i32
  }
  func.func @transform_7(%arg0: i32) -> (i32, i32) {
    %c0_i32 = arith.constant 0 : i32
    %c0_i32_0 = arith.constant 0 : i32
    %c0_i32_1 = arith.constant 0 : i32
    return %c0_i32, %c0_i32_0 : i32, i32
  }
  func.func @transform_8(%arg0: i32) -> (i32, i32) {
    %c0_i32 = arith.constant 0 : i32
    %c0_i32_0 = arith.constant 0 : i32
    %c0_i32_1 = arith.constant 0 : i32
    return %c0_i32, %c0_i32_0 : i32, i32
  }
  func.func @transform_9(%arg0: i32) -> (i32, i32) {
    %c0_i32 = arith.constant 0 : i32
    %c0_i32_0 = arith.constant 0 : i32
    %c0_i32_1 = arith.constant 0 : i32
    return %c0_i32, %c0_i32_0 : i32, i32
  }
  func.func @transform_10(%arg0: i32) -> (i32, i32) {
    %c0_i32 = arith.constant 0 : i32
    %c0_i32_0 = arith.constant 0 : i32
    %c0_i32_1 = arith.constant 0 : i32
    return %c0_i32, %c0_i32_0 : i32, i32
  }
  func.func @transform_11(%arg0: i32) -> (i32, i32) {
    %c0_i32 = arith.constant 0 : i32
    %c0_i32_0 = arith.constant 0 : i32
    %c0_i32_1 = arith.constant 0 : i32
    return %c0_i32, %c0_i32_0 : i32, i32
  }
  func.func @transform_12(%arg0: i32) -> (i32, i32) {
    %c0_i32 = arith.constant 0 : i32
    %c0_i32_0 = arith.constant 0 : i32
    %c0_i32_1 = arith.constant 0 : i32
    return %c0_i32, %c0_i32_0 : i32, i32
  }
  func.func @transform_13(%arg0: i32) -> (i32, i32) {
    %c0_i32 = arith.constant 0 : i32
    %c0_i32_0 = arith.constant 0 : i32
    %c0_i32_1 = arith.constant 0 : i32
    return %c0_i32, %c0_i32_0 : i32, i32
  }
  func.func @transform_14(%arg0: i32) -> (i32, i32) {
    %c0_i32 = arith.constant 0 : i32
    %c0_i32_0 = arith.constant 0 : i32
    %c0_i32_1 = arith.constant 0 : i32
    return %c0_i32, %c0_i32_0 : i32, i32
  }
  func.func @transform_15(%arg0: i32) -> (i32, i32) {
    %c0_i32 = arith.constant 0 : i32
    %c0_i32_0 = arith.constant 0 : i32
    %c0_i32_1 = arith.constant 0 : i32
    return %c0_i32, %c0_i32_0 : i32, i32
  }
  func.func @transform_16(%arg0: i32) -> (i32, i32) {
    %c0_i32 = arith.constant 0 : i32
    %c0_i32_0 = arith.constant 0 : i32
    %c0_i32_1 = arith.constant 0 : i32
    return %c0_i32, %c0_i32_0 : i32, i32
  }
  func.func @transform_17(%arg0: i32) -> (i32, i32) {
    %c0_i32 = arith.constant 0 : i32
    %c0_i32_0 = arith.constant 0 : i32
    %c0_i32_1 = arith.constant 0 : i32
    return %c0_i32, %c0_i32_0 : i32, i32
  }
  func.func @transform_18(%arg0: i32) -> (i32, i32) {
    %c0_i32 = arith.constant 0 : i32
    %c0_i32_0 = arith.constant 0 : i32
    %c0_i32_1 = arith.constant 0 : i32
    return %c0_i32, %c0_i32_0 : i32, i32
  }
  func.func @transform_19(%arg0: i32) -> (i32, i32) {
    %c0_i32 = arith.constant 0 : i32
    %c0_i32_0 = arith.constant 0 : i32
    %c0_i32_1 = arith.constant 0 : i32
    return %c0_i32, %c0_i32_0 : i32, i32
  }
  func.func @transform_20(%arg0: i32) -> (i32, i32) {
    %c0_i32 = arith.constant 0 : i32
    %c0_i32_0 = arith.constant 0 : i32
    %c0_i32_1 = arith.constant 0 : i32
    return %c0_i32, %c0_i32_0 : i32, i32
  }
  func.func @transform_21(%arg0: i32) -> (i32, i32) {
    %c0_i32 = arith.constant 0 : i32
    %c0_i32_0 = arith.constant 0 : i32
    %c0_i32_1 = arith.constant 0 : i32
    return %c0_i32, %c0_i32_0 : i32, i32
  }
  func.func @transform_22(%arg0: i32) -> (i32, i32) {
    %c0_i32 = arith.constant 0 : i32
    %c0_i32_0 = arith.constant 0 : i32
    %c0_i32_1 = arith.constant 0 : i32
    return %c0_i32, %c0_i32_0 : i32, i32
  }
  func.func @transform_23(%arg0: i32) -> (i32, i32) {
    %c0_i32 = arith.constant 0 : i32
    %c0_i32_0 = arith.constant 0 : i32
    %c0_i32_1 = arith.constant 0 : i32
    return %c0_i32, %c0_i32_0 : i32, i32
  }
  func.func @transform_24(%arg0: i32) -> (i32, i32) {
    %c0_i32 = arith.constant 0 : i32
    %c0_i32_0 = arith.constant 0 : i32
    %c0_i32_1 = arith.constant 0 : i32
    return %c0_i32, %c0_i32_0 : i32, i32
  }
  func.func @transform_25(%arg0: i32) -> (i32, i32) {
    %c0_i32 = arith.constant 0 : i32
    %c0_i32_0 = arith.constant 0 : i32
    %c0_i32_1 = arith.constant 0 : i32
    return %c0_i32, %c0_i32_0 : i32, i32
  }
  func.func @transform_26(%arg0: i32) -> (i32, i32) {
    %c0_i32 = arith.constant 0 : i32
    %c0_i32_0 = arith.constant 0 : i32
    %c0_i32_1 = arith.constant 0 : i32
    return %c0_i32, %c0_i32_0 : i32, i32
  }
  func.func @transform_27(%arg0: i32) -> (i32, i32) {
    %c0_i32 = arith.constant 0 : i32
    %c0_i32_0 = arith.constant 0 : i32
    %c0_i32_1 = arith.constant 0 : i32
    return %c0_i32, %c0_i32_0 : i32, i32
  }
  func.func @transform_28(%arg0: i32) -> (i32, i32) {
    %c0_i32 = arith.constant 0 : i32
    %c0_i32_0 = arith.constant 0 : i32
    %c0_i32_1 = arith.constant 0 : i32
    return %c0_i32, %c0_i32_0 : i32, i32
  }
  func.func @transform_29(%arg0: i32) -> (i32, i32) {
    %c0_i32 = arith.constant 0 : i32
    %c0_i32_0 = arith.constant 0 : i32
    %c0_i32_1 = arith.constant 0 : i32
    return %c0_i32, %c0_i32_0 : i32, i32
  }
  func.func @transform_30(%arg0: i32) -> (i32, i32) {
    %c0_i32 = arith.constant 0 : i32
    %c0_i32_0 = arith.constant 0 : i32
    %c0_i32_1 = arith.constant 0 : i32
    return %c0_i32, %c0_i32_0 : i32, i32
  }
  func.func @transform_31(%arg0: i32) -> (i32, i32) {
    %c0_i32 = arith.constant 0 : i32
    %c0_i32_0 = arith.constant 0 : i32
    %c0_i32_1 = arith.constant 0 : i32
    return %c0_i32, %c0_i32_0 : i32, i32
  }
  func.func @transform_32(%arg0: i32) -> (i32, i32) {
    %c0_i32 = arith.constant 0 : i32
    %c0_i32_0 = arith.constant 0 : i32
    %c0_i32_1 = arith.constant 0 : i32
    return %c0_i32, %c0_i32_0 : i32, i32
  }
  func.func @transform_33(%arg0: i32) -> (i32, i32) {
    %c0_i32 = arith.constant 0 : i32
    %c0_i32_0 = arith.constant 0 : i32
    %c0_i32_1 = arith.constant 0 : i32
    return %c0_i32, %c0_i32_0 : i32, i32
  }
  func.func @transform_34(%arg0: i32) -> (i32, i32) {
    %c0_i32 = arith.constant 0 : i32
    %c0_i32_0 = arith.constant 0 : i32
    %c0_i32_1 = arith.constant 0 : i32
    return %c0_i32, %c0_i32_0 : i32, i32
  }
}

</mosaic_0001>

<bundles_post_ra>
// kernel: tpu_custom_call.1
= control target key start
LH: loop header
LB: loop body
LE: loop exit
PB: predicated region body
PF: predicated region fallthrough
CT: control target
= control target key end

     0   :  { %s2752_s6 = smov 1   ;;  %s2753_s10 = smov 2   ;;  %s3289_s0 = inlined_call_operand.smem [shape: u32[35], index: -1, kind: input, shape index: {}] }
   0x1   :  { %s2827_s5 = sld [smem:[%s3289_s0]]   ;;  %s2754_s14 = smov 3  }
   0x2   :  { %s2832_s9 = sld [smem:[%s3289_s0 + %s2752_s6]]   ;;  %s2755_s18 = smov 4  }
   0x3   :  { %s2837_s13 = sld [smem:[%s3289_s0 + %s2753_s10]]   ;;  %s2756_s22 = smov 5  }
   0x4   :  { %s2842_s17 = sld [smem:[%s3289_s0 + %s2754_s14]]   ;;  %s2757_s26 = smov 6  }
   0x5   :  { %s2847_s21 = sld [smem:[%s3289_s0 + %s2755_s18]]   ;;  %s2758_s30 = smov 7  }
   0x6   :  { %s2852_s25 = sld [smem:[%s3289_s0 + %s2756_s22]]   ;;  %s2759_s4 = smov 8  }
   0x7   :  { %3302 = sst [smem:[#allocation53_spill]] %s2827_s5  ;;  %s2760_s10 = smov 9  }
   0x8   :  { %s2857_s29 = sld [smem:[%s3289_s0 + %s2757_s26]]   ;;  %s2761_s15 = smov 10  }
   0x9   :  { %3303 = sst [smem:[#allocation54_spill]] %s2837_s13  ;;  %s2762_s20 = smov 11  }
   0xa   :  { %3304 = sst [smem:[#allocation55_spill]] %s2842_s17  ;;  %s2763_s26 = smov 12  }
   0xb   :  { %s2862_s3 = sld [smem:[%s3289_s0 + %s2758_s30]]   ;;  %s2764_s1 = smov 13  }
   0xc   :  { %s2867_s8 = sld [smem:[%s3289_s0 + %s2759_s4]]   ;;  %s2765_s7 = smov 14  }
   0xd   :  { %s2872_s14 = sld [smem:[%s3289_s0 + %s2760_s10]]   ;;  %s2767_s22 = smov 16  }
   0xe   :  { %3305 = sst [smem:[#allocation56_spill]] %s2857_s29  ;;  %s2768_s28 = smov 17  }
   0xf   :  { %s2877_s19 = sld [smem:[%s3289_s0 + %s2761_s15]]   ;;  %s2766_s15 = smov 15  }
  0x10   :  { %s2882_s24 = sld [smem:[%s3289_s0 + %s2762_s20]]  }
  0x11   :  { %s2887_s30 = sld [smem:[%s3289_s0 + %s2763_s26]]  }
  0x12   :  { %s2892_s6 = sld [smem:[%s3289_s0 + %s2764_s1]]  }
  0x13   :  { %s2897_s12 = sld [smem:[%s3289_s0 + %s2765_s7]]   ;;  %s2769_s7 = smov 18  }
  0x14   :  { %s2902_s20 = sld [smem:[%s3289_s0 + %s2766_s15]]   ;;  %s2770_s15 = smov 19  }
  0x15   :  { %3306 = sst [smem:[#allocation57_spill]] %s2877_s19 }
  0x16   :  { %s2907_s27 = sld [smem:[%s3289_s0 + %s2767_s22]]   ;;  %s2771_s22 = smov 20  }
  0x17   :  { %3307 = sst [smem:[#allocation58_spill]] %s2887_s30 }
  0x18   :  { %s2912_s4 = sld [smem:[%s3289_s0 + %s2768_s28]]   ;;  %s2772_s28 = smov 21  }
  0x19   :  { %3308 = sst [smem:[#allocation59_spill]] %s2897_s12 }
  0x1a   :  { %s2917_s17 = sld [smem:[%s3289_s0 + %s2769_s7]]   ;;  %s2773_s7 = smov 22  }
  0x1b   :  { %s2922_s13 = sld [smem:[%s3289_s0 + %s2770_s15]]   ;;  %s2774_s15 = smov 23  }
  0x1c   :  { %3309 = sst [smem:[#allocation60_spill]] %s2907_s27 }
  0x1d   :  { %s2927_s29 = sld [smem:[%s3289_s0 + %s2771_s22]]   ;;  %s2775_s22 = smov 24  }
  0x1e   :  { %s2932_s5 = sld [smem:[%s3289_s0 + %s2772_s28]]   ;;  %s2776_s28 = smov 25  }
  0x1f   :  { %s2942_s27 = sld [smem:[%s3289_s0 + %s2774_s15]]   ;;  %s2778_s15 = smov 27  }
  0x20   :  { %3310 = sst [smem:[#allocation61_spill]] %s2917_s17 }
  0x21   :  { %s2937_s17 = sld [smem:[%s3289_s0 + %s2773_s7]]   ;;  %s2777_s7 = smov 26  }
  0x22   :  { %s2952_s12 = sld [smem:[%s3289_s0 + %s2776_s28]]   ;;  %s2780_s28 = smov 29  }
  0x23   :  { %3311 = sst [smem:[#allocation62_spill]] %s2927_s29 }
  0x24   :  { %s2947_s29 = sld [smem:[%s3289_s0 + %s2775_s22]]   ;;  %s2779_s22 = smov 28  }
  0x25   :  { %3313 = sst [smem:[#allocation64_spill]] %s2942_s27 }
  0x26   :  { %s2962_s27 = sld [smem:[%s3289_s0 + %s2778_s15]]   ;;  %s2782_s15 = smov 31  }
  0x27   :  { %3312 = sst [smem:[#allocation63_spill]] %s2937_s17 }
  0x28   :  { %3315 = sst [smem:[#allocation66_spill]] %s2952_s12 }
  0x29   :  { %s2957_s17 = sld [smem:[%s3289_s0 + %s2777_s7]]   ;;  %s2781_s7 = smov 30  }
  0x2a   :  { %3314 = sst [smem:[#allocation65_spill]] %s2947_s29 }
  0x2b   :  { %s2967_s29 = sld [smem:[%s3289_s0 + %s2779_s22]]   ;;  %s2783_s22 = smov 32  }
  0x2c   :  { %3316 = sst [smem:[#allocation67_spill]] %s2962_s27 }
  0x2d   :  { %s2972_s12 = sld [smem:[%s3289_s0 + %s2780_s28]]   ;;  %s2784_s28 = smov 33  }
  0x2e   :  { %s2977_s30 = sld [smem:[%s3289_s0 + %s2781_s7]]   ;;  %s2785_s7 = smov 34  }
  0x2f   :  { %s2982_s27 = sld [smem:[%s3289_s0 + %s2782_s15]]  }
  0x30   :  { %s2997_s19 = sld [smem:[%s3289_s0 + %s2785_s7]]  }
  0x31   :  { %3317 = sst [smem:[#allocation68_spill]] %s2967_s29 }
  0x32   :  { %s2987_s29 = sld [smem:[%s3289_s0 + %s2783_s22]]  }
  0x33   :  { %3318 = sst [smem:[#allocation69_spill]] %s2972_s12 }
  0x34   :  { %s2992_s12 = sld [smem:[%s3289_s0 + %s2784_s28]]  }
  0x35   :  { %74 = vsyncpa [#allocation4], 0 }
  0x36   :  { %75 = vsyncpa [#allocation7], 0 }
  0x37   :  { %76 = vsyncpa [#allocation10], 0 }
  0x38   :  { %77 = vsyncpa [#allocation13], 0 }
  0x39   :  { %78 = vsyncpa [#allocation16], 0 }
  0x3a   :  { %79 = vsyncpa [#allocation19], 0 }
  0x3b   :  { %80 = vsyncpa [#allocation22], 0 }
  0x3c   :  { %81 = vsyncpa [#allocation25], 0 }
  0x3d   :  { %82 = vsyncpa [#allocation28], 0 }
  0x3e   :  { %83 = vsyncpa [#allocation31], 0 }
  0x3f   :  { %84 = vsyncpa [#allocation34], 0 }
  0x40   :  { %85 = vsyncpa [#allocation37], 0 }
  0x41   :  { %86 = vsyncpa [#allocation5], 0  ;;  %s2786_s15 = smov [#allocation6]   ;;  %s2787_s0 = smov [#allocation9]  }
  0x42   :  { %s111_s16 = sshll.u32 %s2786_s15, 4  ;;  %s133_s18 = sshll.u32 %s2787_s0, 4  ;;  %s112_s16 = int_to_ptr.vmem [resolvable:$true] %s111_s16  ;;  %s134_s18 = int_to_ptr.vmem [resolvable:$true] %s133_s18 }
  0x43   :  { %s2198_s22 = scalar_lea.hbm %s2847_s21, 128 }
  0x44   :  { %p2199_p0 = scmp.ne.s32.totalorder %s2847_s21, %s2198_s22  ;;  %p2202_p1 = scmp.lt.u32.totalorder %s2198_s22, %s2847_s21 }
  0x46   :  { %p2204_p2 = pnand %p2202_p1, %p2199_p0 }
  0x48   :  { %2207 = shalt.err (!%p2204_p2)
}
  0x49   :  { %s2208_s23 = scalar_lea.vmem %s112_s16, 128  ;;  %p2213_p4 = scmp.lt.s32.totalorder %s112_s16, %s112_s16 }
  0x4a   :  { %p2209_p3 = scmp.ne.s32.totalorder %s112_s16, %s2208_s23  ;;  %p2214_p5 = scmp.lt.s32.totalorder %s2208_s23, %s2208_s23 }
  0x4c   :  { %p2215_p6 = por %p2214_p5, %p2213_p4 }
  0x4e   :  { %p2216_p7 = pnand %p2215_p6, %p2209_p3 }
  0x50   :  { %2219 = shalt.err (!%p2216_p7)
}
  0x51   :  { %114 = dma.hbm_to_vmem [thread:$0]  %s2847_s21, 128, %s112_s16, [#allocation7]  }
  0x52   :  { %s2220_s26 = scalar_lea.hbm %s2862_s3, 16 }
  0x53   :  { %p2221_p8 = scmp.ne.s32.totalorder %s2862_s3, %s2220_s26  ;;  %p2224_p9 = scmp.lt.u32.totalorder %s2220_s26, %s2862_s3 }
  0x55   :  { %p2226_p10 = pnand %p2224_p9, %p2221_p8 }
  0x57   :  { %2229 = shalt.err (!%p2226_p10)
}
  0x58   :  { %s2230_s28 = scalar_lea.vmem %s134_s18, 16  ;;  %s2234_s1 = scalar_lea.vmem %s134_s18, 32 }
  0x59   :  { %p2231_p11 = scmp.ne.s32.totalorder %s134_s18, %s2230_s28  ;;  %p2235_p12 = scmp.lt.s32.totalorder %s134_s18, %s134_s18 }
  0x5a   :  { %p2236_p13 = scmp.lt.s32.totalorder %s2234_s1, %s2230_s28 }
  0x5c   :  { %p2237_p0 = por %p2236_p13, %p2235_p12 }
  0x5e   :  { %p2238_p1 = pnand %p2237_p0, %p2231_p11 }
  0x60   :  { %2241 = shalt.err (!%p2238_p1)
}
  0x61   :  { %136 = dma.hbm_to_vmem [thread:$0]  %s2862_s3, 16, %s134_s18, [#allocation10]  }
  0x62   :  { %s2788_s2 = smov [#allocation12]   ;;  %s2789_s7 = smov [#allocation15]  }
  0x63   :  { %s153_s21 = sshll.u32 %s2788_s2, 4  ;;  %s175_s10 = sshll.u32 %s2789_s7, 4  ;;  %s154_s21 = int_to_ptr.vmem [resolvable:$true] %s153_s21  ;;  %s176_s10 = int_to_ptr.vmem [resolvable:$true] %s175_s10 }
  0x64   :  { %s2242_s11 = scalar_lea.hbm %s2872_s14, 16 }
  0x65   :  { %p2243_p2 = scmp.ne.s32.totalorder %s2872_s14, %s2242_s11  ;;  %p2246_p3 = scmp.lt.u32.totalorder %s2242_s11, %s2872_s14 }
  0x67   :  { %p2248_p4 = pnand %p2246_p3, %p2243_p2 }
  0x69   :  { %2251 = shalt.err (!%p2248_p4)
}
  0x6a   :  { %s2252_s15 = scalar_lea.vmem %s154_s21, 16  ;;  %s2256_s16 = scalar_lea.vmem %s154_s21, 32 }
  0x6b   :  { %p2253_p5 = scmp.ne.s32.totalorder %s154_s21, %s2252_s15  ;;  %p2257_p6 = scmp.lt.s32.totalorder %s154_s21, %s154_s21 }
  0x6c   :  { %p2258_p7 = scmp.lt.s32.totalorder %s2256_s16, %s2252_s15 }
  0x6e   :  { %p2259_p8 = por %p2258_p7, %p2257_p6 }
  0x70   :  { %p2260_p9 = pnand %p2259_p8, %p2253_p5 }
  0x72   :  { %2263 = shalt.err (!%p2260_p9)
}
  0x73   :  { %156 = dma.hbm_to_vmem [thread:$0]  %s2872_s14, 16, %s154_s21, [#allocation13]  }
  0x74   :  { %s2264_s3 = scalar_lea.hbm %s2882_s24, 16 }
  0x75   :  { %p2265_p10 = scmp.ne.s32.totalorder %s2882_s24, %s2264_s3  ;;  %p2268_p11 = scmp.lt.u32.totalorder %s2264_s3, %s2882_s24 }
  0x77   :  { %p2270_p12 = pnand %p2268_p11, %p2265_p10 }
  0x79   :  { %2273 = shalt.err (!%p2270_p12)
}
  0x7a   :  { %s2274_s0 = scalar_lea.vmem %s176_s10, 16  ;;  %s2278_s18 = scalar_lea.vmem %s176_s10, 32 }
  0x7b   :  { %p2275_p13 = scmp.ne.s32.totalorder %s176_s10, %s2274_s0  ;;  %p2279_p0 = scmp.lt.s32.totalorder %s176_s10, %s176_s10 }
  0x7c   :  { %p2280_p1 = scmp.lt.s32.totalorder %s2278_s18, %s2274_s0 }
  0x7e   :  { %p2281_p2 = por %p2280_p1, %p2279_p0 }
  0x80   :  { %p2282_p3 = pnand %p2281_p2, %p2275_p13 }
  0x82   :  { %2285 = shalt.err (!%p2282_p3)
}
  0x83   :  { %178 = dma.hbm_to_vmem [thread:$0]  %s2882_s24, 16, %s176_s10, [#allocation16]  }
  0x84   :  { %s2790_s22 = smov [#allocation18]   ;;  %s2791_s23 = smov [#allocation21]  }
  0x85   :  { %s197_s14 = sshll.u32 %s2790_s22, 4  ;;  %s217_s26 = sshll.u32 %s2791_s23, 4  ;;  %s198_s14 = int_to_ptr.vmem [resolvable:$true] %s197_s14  ;;  %s218_s26 = int_to_ptr.vmem [resolvable:$true] %s217_s26 }
  0x86   :  { %s2286_s28 = scalar_lea.hbm %s2892_s6, 16 }
  0x87   :  { %p2287_p4 = scmp.ne.s32.totalorder %s2892_s6, %s2286_s28  ;;  %p2290_p5 = scmp.lt.u32.totalorder %s2286_s28, %s2892_s6 }
  0x89   :  { %p2292_p6 = pnand %p2290_p5, %p2287_p4 }
  0x8b   :  { %2295 = shalt.err (!%p2292_p6)
}
  0x8c   :  { %s2296_s1 = scalar_lea.vmem %s198_s14, 16  ;;  %s2300_s2 = scalar_lea.vmem %s198_s14, 32 }
  0x8d   :  { %p2297_p7 = scmp.ne.s32.totalorder %s198_s14, %s2296_s1  ;;  %p2301_p8 = scmp.lt.s32.totalorder %s198_s14, %s198_s14 }
  0x8e   :  { %p2302_p9 = scmp.lt.s32.totalorder %s2300_s2, %s2296_s1 }
  0x90   :  { %p2303_p10 = por %p2302_p9, %p2301_p8 }
  0x92   :  { %p2304_p11 = pnand %p2303_p10, %p2297_p7 }
  0x94   :  { %2307 = shalt.err (!%p2304_p11)
}
  0x95   :  { %200 = dma.hbm_to_vmem [thread:$0]  %s2892_s6, 16, %s198_s14, [#allocation19]  }
  0x96   :  { %s2308_s24 = scalar_lea.hbm %s2902_s20, 16 }
  0x97   :  { %p2309_p12 = scmp.ne.s32.totalorder %s2902_s20, %s2308_s24  ;;  %p2312_p13 = scmp.lt.u32.totalorder %s2308_s24, %s2902_s20 }
  0x99   :  { %p2314_p0 = pnand %p2312_p13, %p2309_p12 }
  0x9b   :  { %2317 = shalt.err (!%p2314_p0)
}
  0x9c   :  { %s2318_s21 = scalar_lea.vmem %s218_s26, 16  ;;  %s2322_s7 = scalar_lea.vmem %s218_s26, 32 }
  0x9d   :  { %p2319_p1 = scmp.ne.s32.totalorder %s218_s26, %s2318_s21  ;;  %p2323_p2 = scmp.lt.s32.totalorder %s218_s26, %s218_s26 }
  0x9e   :  { %p2324_p3 = scmp.lt.s32.totalorder %s2322_s7, %s2318_s21 }
  0xa0   :  { %p2325_p4 = por %p2324_p3, %p2323_p2 }
  0xa2   :  { %p2326_p5 = pnand %p2325_p4, %p2319_p1 }
  0xa4   :  { %2329 = shalt.err (!%p2326_p5)
}
  0xa5   :  { %220 = dma.hbm_to_vmem [thread:$0]  %s2902_s20, 16, %s218_s26, [#allocation22]  }
  0xa6   :  { %s2792_s10 = smov [#allocation24]   ;;  %s2793_s11 = smov [#allocation27]  }
  0xa7   :  { %s239_s6 = sshll.u32 %s2792_s10, 4  ;;  %s261_s15 = sshll.u32 %s2793_s11, 4  ;;  %s240_s6 = int_to_ptr.vmem [resolvable:$true] %s239_s6  ;;  %s262_s15 = int_to_ptr.vmem [resolvable:$true] %s261_s15 }
  0xa8   :  { %s2330_s16 = scalar_lea.hbm %s2912_s4, 16 }
  0xa9   :  { %p2331_p6 = scmp.ne.s32.totalorder %s2912_s4, %s2330_s16  ;;  %p2334_p7 = scmp.lt.u32.totalorder %s2330_s16, %s2912_s4 }
  0xab   :  { %p2336_p8 = pnand %p2334_p7, %p2331_p6 }
  0xad   :  { %2339 = shalt.err (!%p2336_p8)
}
  0xae   :  { %s2340_s3 = scalar_lea.vmem %s240_s6, 16  ;;  %s2344_s0 = scalar_lea.vmem %s240_s6, 32 }
  0xaf   :  { %p2341_p9 = scmp.ne.s32.totalorder %s240_s6, %s2340_s3  ;;  %p2345_p10 = scmp.lt.s32.totalorder %s240_s6, %s240_s6 }
  0xb0   :  { %p2346_p11 = scmp.lt.s32.totalorder %s2344_s0, %s2340_s3 }
  0xb2   :  { %p2347_p12 = por %p2346_p11, %p2345_p10 }
  0xb4   :  { %p2348_p13 = pnand %p2347_p12, %p2341_p9 }
  0xb6   :  { %2351 = shalt.err (!%p2348_p13)
}
  0xb7   :  { %242 = dma.hbm_to_vmem [thread:$0]  %s2912_s4, 16, %s240_s6, [#allocation25]  }
  0xb8   :  { %s2352_s20 = scalar_lea.hbm %s2922_s13, 16 }
  0xb9   :  { %p2353_p0 = scmp.ne.s32.totalorder %s2922_s13, %s2352_s20  ;;  %p2356_p1 = scmp.lt.u32.totalorder %s2352_s20, %s2922_s13 }
  0xbb   :  { %p2358_p2 = pnand %p2356_p1, %p2353_p0 }
  0xbd   :  { %2361 = shalt.err (!%p2358_p2)
}
  0xbe   :  { %s2362_s18 = scalar_lea.vmem %s262_s15, 16  ;;  %s2366_s22 = scalar_lea.vmem %s262_s15, 32 }
  0xbf   :  { %p2363_p3 = scmp.ne.s32.totalorder %s262_s15, %s2362_s18  ;;  %p2367_p4 = scmp.lt.s32.totalorder %s262_s15, %s262_s15 }
  0xc0   :  { %p2368_p5 = scmp.lt.s32.totalorder %s2366_s22, %s2362_s18 }
  0xc2   :  { %p2369_p6 = por %p2368_p5, %p2367_p4 }
  0xc4   :  { %p2370_p7 = pnand %p2369_p6, %p2363_p3 }
  0xc6   :  { %2373 = shalt.err (!%p2370_p7)
}
  0xc7   :  { %264 = dma.hbm_to_vmem [thread:$0]  %s2922_s13, 16, %s262_s15, [#allocation28]  }
  0xc8   :  { %s2794_s14 = smov [#allocation30]   ;;  %s2374_s23 = scalar_lea.hbm %s2932_s5, 16 }
  0xc9   :  { %s281_s4 = sshll.u32 %s2794_s14, 4  ;;  %p2375_p8 = scmp.ne.s32.totalorder %s2932_s5, %s2374_s23  ;;  %s282_s4 = int_to_ptr.vmem [resolvable:$true] %s281_s4 }
  0xca   :  { %p2378_p9 = scmp.lt.u32.totalorder %s2374_s23, %s2932_s5 }
  0xcc   :  { %p2380_p10 = pnand %p2378_p9, %p2375_p8 }
  0xce   :  { %2383 = shalt.err (!%p2380_p10)
}
  0xcf   :  { %s2384_s26 = scalar_lea.vmem %s282_s4, 16  ;;  %s2388_s28 = scalar_lea.vmem %s282_s4, 32 }
  0xd0   :  { %p2385_p11 = scmp.ne.s32.totalorder %s282_s4, %s2384_s26  ;;  %p2389_p12 = scmp.lt.s32.totalorder %s282_s4, %s282_s4 }
  0xd1   :  { %p2390_p13 = scmp.lt.s32.totalorder %s2388_s28, %s2384_s26 }
  0xd3   :  { %p2391_p0 = por %p2390_p13, %p2389_p12 }
  0xd5   :  { %p2392_p1 = pnand %p2391_p0, %p2385_p11 }
  0xd7   :  { %2395 = shalt.err (!%p2392_p1)
}
  0xd8   :  { %284 = dma.hbm_to_vmem [thread:$0]  %s2932_s5, 16, %s282_s4, [#allocation31]  }
  0xd9   :  { %s2795_s13 = smov [#allocation33]   ;;  %s2796_s2 = smov [#allocation36]  }
  0xda   :  { %s308_s1 = sshll.u32 %s2795_s13, 4  ;;  %s336_s24 = sshll.u32 %s2796_s2, 4  ;;  %s309_s1 = int_to_ptr.vmem [resolvable:$true] %s308_s1  ;;  %s337_s24 = int_to_ptr.vmem [resolvable:$true] %s336_s24 }
  0xdb   :  { %s2396_s21 = scalar_lea.hbm %s2957_s17, 1536 }
  0xdc   :  { %p2397_p2 = scmp.ne.s32.totalorder %s2957_s17, %s2396_s21  ;;  %p2400_p3 = scmp.lt.u32.totalorder %s2396_s21, %s2957_s17 }
  0xde   :  { %p2402_p4 = pnand %p2400_p3, %p2397_p2 }
  0xe0   :  { %2405 = shalt.err (!%p2402_p4)
}
  0xe1   :  { %s2406_s7 = scalar_lea.vmem %s309_s1, 1536  ;;  %p2411_p6 = scmp.lt.s32.totalorder %s309_s1, %s309_s1 }
  0xe2   :  { %p2407_p5 = scmp.ne.s32.totalorder %s309_s1, %s2406_s7  ;;  %p2412_p7 = scmp.lt.s32.totalorder %s2406_s7, %s2406_s7 }
  0xe4   :  { %p2413_p8 = por %p2412_p7, %p2411_p6 }
  0xe6   :  { %p2414_p9 = pnand %p2413_p8, %p2407_p5 }
  0xe8   :  { %2417 = shalt.err (!%p2414_p9)
}
  0xe9   :  { %s2797_s10 = smov 128   ;;  %s2798_s5 = smov 8  }
  0xea   :  { %314 = dma.hbm_to_vmem [thread:$0]  %s2957_s17, 1536, %s309_s1, [#allocation34], %s2797_s10, %s2797_s10, %s2798_s5  }
  0xeb   :  { %s2418_s6 = scalar_lea.hbm %s2977_s30, 1536 }
  0xec   :  { %p2419_p10 = scmp.ne.s32.totalorder %s2977_s30, %s2418_s6  ;;  %p2422_p11 = scmp.lt.u32.totalorder %s2418_s6, %s2977_s30 }
  0xee   :  { %p2424_p12 = pnand %p2422_p11, %p2419_p10 }
  0xf0   :  { %2427 = shalt.err (!%p2424_p12)
}
  0xf1   :  { %s2428_s11 = scalar_lea.vmem %s337_s24, 1536  ;;  %p2433_p0 = scmp.lt.s32.totalorder %s337_s24, %s337_s24 }
  0xf2   :  { %p2429_p13 = scmp.ne.s32.totalorder %s337_s24, %s2428_s11  ;;  %p2434_p1 = scmp.lt.s32.totalorder %s2428_s11, %s2428_s11 }
  0xf4   :  { %p2435_p2 = por %p2434_p1, %p2433_p0 }
  0xf6   :  { %p2436_p3 = pnand %p2435_p2, %p2429_p13 }
  0xf8   :  { %2439 = shalt.err (!%p2436_p3)
}
  0xf9   :  { %342 = dma.hbm_to_vmem [thread:$0]  %s2977_s30, 1536, %s337_s24, [#allocation37], %s2797_s10, %s2797_s10, %s2798_s5  }
  0xfa   :  { %s2799_s17 = smov [#allocation3]   ;;  %s2800_s16 = smov [#allocation8]  }
  0xfb   :  { %s94_s15 = sshll.u32 %s2799_s17, 4  ;;  %s121_s3 = sshll.u32 %s2800_s16, 4  ;;  %s95_s15 = int_to_ptr.vmem [resolvable:$true] %s94_s15  ;;  %s122_s3 = int_to_ptr.vmem [resolvable:$true] %s121_s3 }
  0xfc   :  { %s2440_s0 = scalar_lea.hbm %s2832_s9, 256 }
  0xfd   :  { %p2441_p4 = scmp.ne.s32.totalorder %s2832_s9, %s2440_s0  ;;  %p2444_p5 = scmp.lt.u32.totalorder %s2440_s0, %s2832_s9 }
  0xff   :  { %p2446_p6 = pnand %p2444_p5, %p2441_p4 }
 0x101   :  { %2449 = shalt.err (!%p2446_p6)
}
 0x102   :  { %s2450_s20 = scalar_lea.vmem %s95_s15, 256  ;;  %p2455_p8 = scmp.lt.s32.totalorder %s95_s15, %s95_s15 }
 0x103   :  { %p2451_p7 = scmp.ne.s32.totalorder %s95_s15, %s2450_s20  ;;  %p2456_p9 = scmp.lt.s32.totalorder %s2450_s20, %s2450_s20 }
 0x105   :  { %p2457_p10 = por %p2456_p9, %p2455_p8 }
 0x107   :  { %p2458_p11 = pnand %p2457_p10, %p2451_p7 }
 0x109   :  { %2461 = shalt.err (!%p2458_p11)
}
 0x10a   :  { %100 = dma.hbm_to_vmem [thread:$0]  %s2832_s9, 256, %s95_s15, [#allocation4], %s2797_s10, %s2797_s10, %s2798_s5  }
 0x10b   :  { %s2462_s30 = scalar_lea.hbm %s2852_s25, 16 }
 0x10c   :  { %p2463_p12 = scmp.ne.s32.totalorder %s2852_s25, %s2462_s30  ;;  %p2466_p13 = scmp.lt.u32.totalorder %s2462_s30, %s2852_s25 }
 0x10e   :  { %p2468_p0 = pnand %p2466_p13, %p2463_p12 }
 0x110   :  { %2471 = shalt.err (!%p2468_p0)
}
 0x111   :  { %s2472_s18 = scalar_lea.vmem %s122_s3, 16  ;;  %s2476_s22 = scalar_lea.vmem %s122_s3, 32 }
 0x112   :  { %p2473_p1 = scmp.ne.s32.totalorder %s122_s3, %s2472_s18  ;;  %p2477_p2 = scmp.lt.s32.totalorder %s122_s3, %s122_s3 }
 0x113   :  { %p2478_p3 = scmp.lt.s32.totalorder %s2476_s22, %s2472_s18 }
 0x115   :  { %p2479_p4 = por %p2478_p3, %p2477_p2 }
 0x117   :  { %p2480_p5 = pnand %p2479_p4, %p2473_p1 }
 0x119   :  { %2483 = shalt.err (!%p2480_p5)
}
 0x11a   :  { %124 = dma.hbm_to_vmem [thread:$0]  %s2852_s25, 16, %s122_s3, [#allocation7]  }
 0x11b   :  { %s2801_s9 = smov [#allocation11]   ;;  %s2802_s4 = smov [#allocation14]  }
 0x11c   :  { %s143_s14 = sshll.u32 %s2801_s9, 4  ;;  %s162_s23 = sshll.u32 %s2802_s4, 4  ;;  %s144_s14 = int_to_ptr.vmem [resolvable:$true] %s143_s14  ;;  %s163_s23 = int_to_ptr.vmem [resolvable:$true] %s162_s23 }
 0x11d   :  { %s2484_s26 = scalar_lea.hbm %s2867_s8, 16 }
 0x11e   :  { %p2485_p6 = scmp.ne.s32.totalorder %s2867_s8, %s2484_s26  ;;  %p2488_p7 = scmp.lt.u32.totalorder %s2484_s26, %s2867_s8 }
 0x120   :  { %p2490_p8 = pnand %p2488_p7, %p2485_p6 }
 0x122   :  { %2493 = shalt.err (!%p2490_p8)
}
 0x123   :  { %s2494_s28 = scalar_lea.vmem %s144_s14, 16  ;;  %s2498_s13 = scalar_lea.vmem %s144_s14, 32 }
 0x124   :  { %p2495_p9 = scmp.ne.s32.totalorder %s144_s14, %s2494_s28  ;;  %p2499_p10 = scmp.lt.s32.totalorder %s144_s14, %s144_s14 }
 0x125   :  { %p2500_p11 = scmp.lt.s32.totalorder %s2498_s13, %s2494_s28 }
 0x127   :  { %p2501_p12 = por %p2500_p11, %p2499_p10 }
 0x129   :  { %p2502_p13 = pnand %p2501_p12, %p2495_p9 }
 0x12b   :  { %2505 = shalt.err (!%p2502_p13)
}
 0x12c   :  { %s3319_s25 = sld [smem:[#allocation57_spill]] }
 0x12d   :  { %146 = dma.hbm_to_vmem [thread:$0]  %s2867_s8, 16, %s144_s14, [#allocation10]  }
 0x132   :  { %s2506_s1 = scalar_lea.hbm %s3319_s25, 512 }
 0x133   :  { %p2507_p0 = scmp.ne.s32.totalorder %s3319_s25, %s2506_s1  ;;  %p2510_p1 = scmp.lt.u32.totalorder %s2506_s1, %s3319_s25 }
 0x135   :  { %p2512_p2 = pnand %p2510_p1, %p2507_p0 }
 0x137   :  { %2515 = shalt.err (!%p2512_p2)
}
 0x138   :  { %s2516_s2 = scalar_lea.vmem %s163_s23, 512  ;;  %p2521_p4 = scmp.lt.s32.totalorder %s163_s23, %s163_s23 }
 0x139   :  { %p2517_p3 = scmp.ne.s32.totalorder %s163_s23, %s2516_s2  ;;  %p2522_p5 = scmp.lt.s32.totalorder %s2516_s2, %s2516_s2 }
 0x13b   :  { %p2523_p6 = por %p2522_p5, %p2521_p4 }
 0x13d   :  { %p2524_p7 = pnand %p2523_p6, %p2517_p3 }
 0x13f   :  { %2527 = shalt.err (!%p2524_p7)
}
 0x140   :  { %s3320_s24 = sld [smem:[#allocation58_spill]]  ;;  %s2803_s8 = smov [#allocation17]  }
 0x141   :  { %168 = dma.hbm_to_vmem [thread:$0]  %s3319_s25, 512, %s163_s23, [#allocation13], %s2797_s10, %s2797_s10, %s2798_s5  }
 0x142   :  { %s184_s21 = sshll.u32 %s2803_s8, 4  ;;  %s2804_s7 = smov [#allocation20]   ;;  %s185_s21 = int_to_ptr.vmem [resolvable:$true] %s184_s21 }
 0x143   :  { %s207_s6 = sshll.u32 %s2804_s7, 4  ;;  %s208_s6 = int_to_ptr.vmem [resolvable:$true] %s207_s6 }
 0x146   :  { %s2528_s11 = scalar_lea.hbm %s3320_s24, 512 }
 0x147   :  { %p2529_p8 = scmp.ne.s32.totalorder %s3320_s24, %s2528_s11  ;;  %p2532_p9 = scmp.lt.u32.totalorder %s2528_s11, %s3320_s24 }
 0x149   :  { %p2534_p10 = pnand %p2532_p9, %p2529_p8 }
 0x14b   :  { %2537 = shalt.err (!%p2534_p10)
}
 0x14c   :  { %s2538_s17 = scalar_lea.vmem %s185_s21, 512  ;;  %p2543_p12 = scmp.lt.s32.totalorder %s185_s21, %s185_s21 }
 0x14d   :  { %p2539_p11 = scmp.ne.s32.totalorder %s185_s21, %s2538_s17  ;;  %p2544_p13 = scmp.lt.s32.totalorder %s2538_s17, %s2538_s17 }
 0x14f   :  { %p2545_p0 = por %p2544_p13, %p2543_p12 }
 0x151   :  { %p2546_p1 = pnand %p2545_p0, %p2539_p11 }
 0x153   :  { %2549 = shalt.err (!%p2546_p1)
}
 0x154   :  { %s3321_s15 = sld [smem:[#allocation59_spill]] }
 0x155   :  { %190 = dma.hbm_to_vmem [thread:$0]  %s3320_s24, 512, %s185_s21, [#allocation16], %s2797_s10, %s2797_s10, %s2798_s5  }
 0x15a   :  { %s2550_s16 = scalar_lea.hbm %s3321_s15, 16 }
 0x15b   :  { %p2551_p2 = scmp.ne.s32.totalorder %s3321_s15, %s2550_s16  ;;  %p2554_p3 = scmp.lt.u32.totalorder %s2550_s16, %s3321_s15 }
 0x15d   :  { %p2556_p4 = pnand %p2554_p3, %p2551_p2 }
 0x15f   :  { %2559 = shalt.err (!%p2556_p4)
}
 0x160   :  { %s2560_s3 = scalar_lea.vmem %s208_s6, 16  ;;  %s2564_s0 = scalar_lea.vmem %s208_s6, 32 }
 0x161   :  { %p2561_p5 = scmp.ne.s32.totalorder %s208_s6, %s2560_s3  ;;  %p2565_p6 = scmp.lt.s32.totalorder %s208_s6, %s208_s6 }
 0x162   :  { %p2566_p7 = scmp.lt.s32.totalorder %s2564_s0, %s2560_s3 }
 0x164   :  { %p2567_p8 = por %p2566_p7, %p2565_p6 }
 0x166   :  { %p2568_p9 = pnand %p2567_p8, %p2561_p5 }
 0x168   :  { %2571 = shalt.err (!%p2568_p9)
}
 0x169   :  { %s3322_s20 = sld [smem:[#allocation60_spill]]  ;;  %s2805_s30 = smov [#allocation23]  }
 0x16a   :  { %210 = dma.hbm_to_vmem [thread:$0]  %s3321_s15, 16, %s208_s6, [#allocation19]  }
 0x16b   :  { %s226_s18 = sshll.u32 %s2805_s30, 4  ;;  %s2806_s22 = smov [#allocation26]   ;;  %s227_s18 = int_to_ptr.vmem [resolvable:$true] %s226_s18 }
 0x16c   :  { %s248_s9 = sshll.u32 %s2806_s22, 4  ;;  %s249_s9 = int_to_ptr.vmem [resolvable:$true] %s248_s9 }
 0x16f   :  { %s2572_s14 = scalar_lea.hbm %s3322_s20, 512 }
 0x170   :  { %p2573_p10 = scmp.ne.s32.totalorder %s3322_s20, %s2572_s14  ;;  %p2576_p11 = scmp.lt.u32.totalorder %s2572_s14, %s3322_s20 }
 0x172   :  { %p2578_p12 = pnand %p2576_p11, %p2573_p10 }
 0x174   :  { %2581 = shalt.err (!%p2578_p12)
}
 0x175   :  { %s2582_s4 = scalar_lea.vmem %s227_s18, 512  ;;  %p2587_p0 = scmp.lt.s32.totalorder %s227_s18, %s227_s18 }
 0x176   :  { %p2583_p13 = scmp.ne.s32.totalorder %s227_s18, %s2582_s4  ;;  %p2588_p1 = scmp.lt.s32.totalorder %s2582_s4, %s2582_s4 }
 0x178   :  { %p2589_p2 = por %p2588_p1, %p2587_p0 }
 0x17a   :  { %p2590_p3 = pnand %p2589_p2, %p2583_p13 }
 0x17c   :  { %2593 = shalt.err (!%p2590_p3)
}
 0x17d   :  { %s3323_s23 = sld [smem:[#allocation61_spill]] }
 0x17e   :  { %232 = dma.hbm_to_vmem [thread:$0]  %s3322_s20, 512, %s227_s18, [#allocation22], %s2797_s10, %s2797_s10, %s2798_s5  }
 0x183   :  { %s2594_s26 = scalar_lea.hbm %s3323_s23, 512 }
 0x184   :  { %p2595_p4 = scmp.ne.s32.totalorder %s3323_s23, %s2594_s26  ;;  %p2598_p5 = scmp.lt.u32.totalorder %s2594_s26, %s3323_s23 }
 0x186   :  { %p2600_p6 = pnand %p2598_p5, %p2595_p4 }
 0x188   :  { %2603 = shalt.err (!%p2600_p6)
}
 0x189   :  { %s2604_s28 = scalar_lea.vmem %s249_s9, 512  ;;  %p2609_p8 = scmp.lt.s32.totalorder %s249_s9, %s249_s9 }
 0x18a   :  { %p2605_p7 = scmp.ne.s32.totalorder %s249_s9, %s2604_s28  ;;  %p2610_p9 = scmp.lt.s32.totalorder %s2604_s28, %s2604_s28 }
 0x18c   :  { %p2611_p10 = por %p2610_p9, %p2609_p8 }
 0x18e   :  { %p2612_p11 = pnand %p2611_p10, %p2605_p7 }
 0x190   :  { %2615 = shalt.err (!%p2612_p11)
}
 0x191   :  { %s3324_s13 = sld [smem:[#allocation62_spill]]  ;;  %s2807_s25 = smov [#allocation29]  }
 0x192   :  { %254 = dma.hbm_to_vmem [thread:$0]  %s3323_s23, 512, %s249_s9, [#allocation25], %s2797_s10, %s2797_s10, %s2798_s5  }
 0x193   :  { %s271_s1 = sshll.u32 %s2807_s25, 4  ;;  %s2808_s2 = smov [#allocation32]   ;;  %s272_s1 = int_to_ptr.vmem [resolvable:$true] %s271_s1 }
 0x194   :  { %s290_s24 = sshll.u32 %s2808_s2, 4  ;;  %s291_s24 = int_to_ptr.vmem [resolvable:$true] %s290_s24 }
 0x197   :  { %s2616_s8 = scalar_lea.hbm %s3324_s13, 16 }
 0x198   :  { %p2617_p12 = scmp.ne.s32.totalorder %s3324_s13, %s2616_s8  ;;  %p2620_p13 = scmp.lt.u32.totalorder %s2616_s8, %s3324_s13 }
 0x19a   :  { %p2622_p0 = pnand %p2620_p13, %p2617_p12 }
 0x19c   :  { %2625 = shalt.err (!%p2622_p0)
}
 0x19d   :  { %s2626_s21 = scalar_lea.vmem %s272_s1, 16  ;;  %s2630_s7 = scalar_lea.vmem %s272_s1, 32 }
 0x19e   :  { %p2627_p1 = scmp.ne.s32.totalorder %s272_s1, %s2626_s21  ;;  %p2631_p2 = scmp.lt.s32.totalorder %s272_s1, %s272_s1 }
 0x19f   :  { %p2632_p3 = scmp.lt.s32.totalorder %s2630_s7, %s2626_s21 }
 0x1a1   :  { %p2633_p4 = por %p2632_p3, %p2631_p2 }
 0x1a3   :  { %p2634_p5 = pnand %p2633_p4, %p2627_p1 }
 0x1a5   :  { %2637 = shalt.err (!%p2634_p5)
}
 0x1a6   :  { %s3325_s6 = sld [smem:[#allocation63_spill]] }
 0x1a7   :  { %274 = dma.hbm_to_vmem [thread:$0]  %s3324_s13, 16, %s272_s1, [#allocation28]  }
 0x1ac   :  { %s2638_s11 = scalar_lea.hbm %s3325_s6, 3072 }
 0x1ad   :  { %p2639_p6 = scmp.ne.s32.totalorder %s3325_s6, %s2638_s11  ;;  %p2642_p7 = scmp.lt.u32.totalorder %s2638_s11, %s3325_s6 }
 0x1af   :  { %p2644_p8 = pnand %p2642_p7, %p2639_p6 }
 0x1b1   :  { %2647 = shalt.err (!%p2644_p8)
}
 0x1b2   :  { %s2648_s17 = scalar_lea.vmem %s291_s24, 3072  ;;  %p2653_p10 = scmp.lt.s32.totalorder %s291_s24, %s291_s24 }
 0x1b3   :  { %p2649_p9 = scmp.ne.s32.totalorder %s291_s24, %s2648_s17  ;;  %p2654_p11 = scmp.lt.s32.totalorder %s2648_s17, %s2648_s17 }
 0x1b5   :  { %p2655_p12 = por %p2654_p11, %p2653_p10 }
 0x1b7   :  { %p2656_p13 = pnand %p2655_p12, %p2649_p9 }
 0x1b9   :  { %2659 = shalt.err (!%p2656_p13)
}
 0x1ba   :  { %s2809_s15 = smov 256   ;;  %s3326_s16 = sld [smem:[#allocation68_spill]] }
 0x1bb   :  { %s2810_s3 = smov 16   ;;  %s2811_s0 = smov [#allocation35]  }
 0x1bc   :  { %296 = dma.hbm_to_vmem [thread:$0]  %s3325_s6, 3072, %s291_s24, [#allocation31], %s2809_s15, %s2809_s15, %s2810_s3  }
 0x1bd   :  { %s322_s20 = sshll.u32 %s2811_s0, 4  ;;  %s2812_s30 = smov [#allocation38]   ;;  %s323_s20 = int_to_ptr.vmem [resolvable:$true] %s322_s20 }
 0x1be   :  { %s350_s18 = sshll.u32 %s2812_s30, 4  ;;  %s351_s18 = int_to_ptr.vmem [resolvable:$true] %s350_s18 }
 0x1c0   :  { %s2660_s22 = scalar_lea.hbm %s3326_s16, 3072 }
 0x1c1   :  { %p2661_p0 = scmp.ne.s32.totalorder %s3326_s16, %s2660_s22  ;;  %p2664_p1 = scmp.lt.u32.totalorder %s2660_s22, %s3326_s16 }
 0x1c3   :  { %p2666_p2 = pnand %p2664_p1, %p2661_p0 }
 0x1c5   :  { %2669 = shalt.err (!%p2666_p2)
}
 0x1c6   :  { %s2670_s9 = scalar_lea.vmem %s323_s20, 3072  ;;  %p2675_p4 = scmp.lt.s32.totalorder %s323_s20, %s323_s20 }
 0x1c7   :  { %p2671_p3 = scmp.ne.s32.totalorder %s323_s20, %s2670_s9  ;;  %p2676_p5 = scmp.lt.s32.totalorder %s2670_s9, %s2670_s9 }
 0x1c9   :  { %p2677_p6 = por %p2676_p5, %p2675_p4 }
 0x1cb   :  { %p2678_p7 = pnand %p2677_p6, %p2671_p3 }
 0x1cd   :  { %2681 = shalt.err (!%p2678_p7)
}
 0x1ce   :  { %328 = dma.hbm_to_vmem [thread:$0]  %s3326_s16, 3072, %s323_s20, [#allocation34], %s2809_s15, %s2809_s15, %s2810_s3  }
 0x1cf   :  { %s2682_s14 = scalar_lea.hbm %s2987_s29, 1536 }
 0x1d0   :  { %p2683_p8 = scmp.ne.s32.totalorder %s2987_s29, %s2682_s14  ;;  %p2686_p9 = scmp.lt.u32.totalorder %s2682_s14, %s2987_s29 }
 0x1d2   :  { %p2688_p10 = pnand %p2686_p9, %p2683_p8 }
 0x1d4   :  { %2691 = shalt.err (!%p2688_p10)
}
 0x1d5   :  { %s2692_s4 = scalar_lea.vmem %s351_s18, 1536  ;;  %p2697_p12 = scmp.lt.s32.totalorder %s351_s18, %s351_s18 }
 0x1d6   :  { %p2693_p11 = scmp.ne.s32.totalorder %s351_s18, %s2692_s4  ;;  %p2698_p13 = scmp.lt.s32.totalorder %s2692_s4, %s2692_s4 }
 0x1d8   :  { %p2699_p0 = por %p2698_p13, %p2697_p12 }
 0x1da   :  { %p2700_p1 = pnand %p2699_p0, %p2693_p11 }
 0x1dc   :  { %2703 = shalt.err (!%p2700_p1)
}
 0x1dd   :  { %356 = dma.hbm_to_vmem [thread:$0]  %s2987_s29, 1536, %s351_s18, [#allocation37], %s2797_s10, %s2797_s10, %s2798_s5  }
 0x1de   :  { %2726 = dma.done.wait [#allocation4], 256  }
 0x1df   :  { %2727 = vsyncadd [#allocation4], 4294967040 }
 0x1e0   :  { %2728 = dma.done.wait [#allocation7], 144  }
 0x1e1   :  { %2729 = vsyncadd [#allocation7], 4294967152 }
 0x1e2   :  { %2730 = dma.done.wait [#allocation10], 32  }
 0x1e3   :  { %2731 = vsyncadd [#allocation10], 4294967264 }
 0x1e4   :  { %2732 = dma.done.wait [#allocation13], 528  }
 0x1e5   :  { %2733 = vsyncadd [#allocation13], 4294966768 }
 0x1e6   :  { %2734 = dma.done.wait [#allocation16], 528  }
 0x1e7   :  { %2735 = vsyncadd [#allocation16], 4294966768 }
 0x1e8   :  { %2736 = dma.done.wait [#allocation19], 32  }
 0x1e9   :  { %2737 = vsyncadd [#allocation19], 4294967264 }
 0x1ea   :  { %2738 = dma.done.wait [#allocation22], 528  }
 0x1eb   :  { %2739 = vsyncadd [#allocation22], 4294966768 }
 0x1ec   :  { %2740 = dma.done.wait [#allocation25], 528  }
 0x1ed   :  { %2741 = vsyncadd [#allocation25], 4294966768 }
 0x1ee   :  { %2742 = dma.done.wait [#allocation28], 32  }
 0x1ef   :  { %2743 = vsyncadd [#allocation28], 4294967264 }
 0x1f0   :  { %2744 = dma.done.wait [#allocation31], 3088  }
 0x1f1   :  { %2745 = vsyncadd [#allocation31], 4294964208 }
 0x1f2   :  { %2746 = dma.done.wait [#allocation34], 4608  }
 0x1f3   :  { %2747 = vsyncadd [#allocation34], 4294962688 }
 0x1f4   :  { %2748 = dma.done.wait [#allocation37], 3072  }
 0x1f5   :  { %2749 = vsyncadd [#allocation37], 4294964224  ;;  %s3327_s29 = sld [smem:[#allocation53_spill]]  ;;  %v2813_v0 = vmov 0.0   ;;  %vm2814_vm0 = vmmov 0   ;;  %v429_v3 = vld [vmem:[#allocation3] sm:$0xff] }
 0x1f6   :  { %1965 = vmatprep.subr.bf16.mxu0 %v2813_v0  ;;  %1967 = vmatprep.mubr.msk.bf16.mxu0 %vm2814_vm0, %v2813_v0  ;;  %v430_v5 = vld [vmem:[#allocation3 + $0x8] sm:$0xff]  ;;  %vm444_vm1 = vcmask 130048   ;;  %v434_v7 = vld [vmem:[#allocation6] sm:$0xff]  ;;  %s3328_s10 = sld [smem:[#allocation56_spill]]  ;;  %vm503_vm2 = vcmask 1043456   ;;  %vm499_vm3 = vcmask 64512  }
 0x1f7   :  { %1971 = vmatprep.subr.bf16.mxu1 %v2813_v0  ;;  %1973 = vmatprep.mubr.msk.bf16.mxu1 %vm2814_vm0, %v2813_v0  ;;  %v3123_v6 = vpack.c.bf16 %v430_v5, %v429_v3  ;;  %v492_v8 = vpack.c.bf16 %v434_v7, %v434_v7  ;;  %v1876_v23 = vld [vmem:[#allocation8] ss:$0 sm:$0xff]  ;;  %vm559_vm4 = vcmask 261120   ;;  %v1878_v33 = vld [vmem:[#allocation9] ss:$0 sm:$0xff]  ;;  %s2815_s5 = smov 32  }
 0x1f8   :  { %vm876_vm5 = vcmask 523520   ;;  %s2816_s23 = smov 64   ;;  %s3329_s26 = sld [smem:[#allocation54_spill]]  ;;  %vm1100_vm6 = vcmask 785920   ;;  %vm1277_vm7 = vcmask 785408   ;;  %vm1744_vm12 = vcmask 15360  }
 0x1f9   :  { %v505_v9 = vsel %vm503_vm2, %v492_v8, 0  ;;  %v1880_v8 = vld [vmem:[#allocation11] ss:$0 sm:$0xff]  ;;  %s3330_s28 = sld [smem:[#allocation65_spill]]  ;;  %s3331_s13 = sld [smem:[#allocation64_spill]]  ;;  %vm1813_vm13 = vcmask 0  }
 0x1fa   :  { %1972 = vmatpush3.bf16.msra.mxu1 %v505_v9  ;;  %s3332_s25 = sld [smem:[#allocation66_spill]]  ;;  %s3333_s1 = sld [smem:[#allocation69_spill]] }
 0x1fb   :  { %v432_v1 = vld [vmem:[%s3327_s29] sm:$0xff]  ;;  %v433_v2 = vld [vmem:[%s3327_s29 + $0x8] sm:$0xff]  ;;  %1985 = vmatprep.subr.bf16.mxu1 %v2813_v0  ;;  %s3334_s2 = sld [smem:[#allocation67_spill]]  ;;  %s3335_s24 = sld [smem:[#allocation55_spill]] }
 0x1fc   :  { %v443_v4 = vpack.c.bf16 %v433_v2, %v432_v1  ;;  %v436_v17 = vld [vmem:[%s3328_s10] sm:$0xff]  ;;  %v437_v18 = vld [vmem:[%s3328_s10 + $0x8] sm:$0xff]  ;;  %v438_v20 = vld [vmem:[%s3328_s10 + $0x10] sm:$0xff]  ;;  %s2818_s7 = smov [#allocation39]  }
 0x1fd   :  { %v551_v19 = vpack.c.bf16 %v437_v18, %v436_v17  ;;  %v439_v21 = vld [vmem:[%s3328_s10 + $0x18] sm:$0xff]  ;;  %v655_v18 = vld [vmem:[#allocation14] sm:$0xff]  ;;  %s1821_s6 = sshll.u32 %s2818_s7, 4  ;;  %s1822_s6 = int_to_ptr.vmem [resolvable:$true] %s1821_s6 }
 0x1fe   :  { %1966 = vmatpush3.bf16.msra.mxu0 %v443_v4  ;;  %v552_v22 = vpack.c.bf16 %v439_v21, %v438_v20  ;;  %v657_v21 = vld [vmem:[#allocation14 + $0x10] sm:$0xff]  ;;  %s2704_s17 = scalar_lea.vmem %s1822_s6, 16  ;;  %s2708_s15 = scalar_lea.vmem %s1822_s6, 32 }
 0x1ff   :  { %1977 = vmatprep.subr.bf16.mxu0 %v2813_v0  ;;  %p2705_p2 = scmp.ne.s32.totalorder %s1822_s6, %s2704_s17  ;;  %p2709_p3 = scmp.lt.s32.totalorder %s1822_s6, %s1822_s6 }
 0x200   :  { %p2710_p4 = scmp.lt.s32.totalorder %s2708_s15, %s2704_s17 }
 0x201   :  { %1968 = vmatmul.mubr.msk.bf16.vlgmr.msra.gmra.mrb[0].mxu0 %vm444_vm1, %v3123_v6 }
 0x202   :  { %1981 = vmatprep.mubr.msk.bf16.mxu0 %vm2814_vm0, %v2813_v0  ;;  %1978 = vmatpush3.bf16.msra.mxu0 %v551_v19  ;;  %v656_v19 = vld [vmem:[#allocation14 + $0x8] sm:$0xff]  ;;  %p2711_p5 = por %p2710_p4, %p2709_p3 }
 0x203   :  { %1979 = vmatprep.subr.bf16.mxu0 %v2813_v0  ;;  %v712_v20 = vpack.c.bf16 %v656_v19, %v655_v18 }
 0x204   :  { %p2712_p6 = pnand %p2711_p5, %p2705_p2 }
 0x206   :  { %1980 = vmatpush3.bf16.msra.mxu0 %v552_v22  ;;  %v658_v22 = vld [vmem:[#allocation14 + $0x18] sm:$0xff] }
 0x207   :  { %1991 = vmatprep.subr.bf16.mxu0 %v2813_v0 }
 0x2d4   :  { %v482_v10 = vpop.f32.mrb[0].mxu0 }
 0x2d5   :  { %v1969_v11 = vpop.f32.mrb[1].mxu0  ;;  %v489_v13 = vadd.f32 %v482_v10, %v432_v1 }
 0x2d6   :  { %v485_v12 = vpop.f32.mrb[2].mxu0 }
 0x2d7   :  { %v490_v14 = vadd.f32 %v485_v12, %v433_v2  ;;  %v1970_v15 = vpop.f32.mrb[3].mxu0  ;;  %v1881_v12 = vld [vmem:[#allocation12] ss:$0 sm:$0xff] }
 0x2d9   :  { %v491_v16 = vpack.c.bf16 %v490_v14, %v489_v13 }
 0x2db   :  { %1974 = vmatmul.mubr.msk.bf16.vlgmr.msra.gmra.mrb[0].mxu1 %vm499_vm3, %v491_v16 }
 0x2dc   :  { %1987 = vmatprep.mubr.msk.bf16.mxu1 %vm2814_vm0, %v2813_v0 }
 0x3ae   :  { %v541_v24 = vpop.f32.mrb[0].mxu1 }
 0x3af   :  { %v542_v25 = vadd.f32 %v1876_v23, %v541_v24  ;;  %v1975_v26 = vpop.f32.mrb[1].mxu1 }
 0x3b0   :  { %v544_v27 = vpop.f32.mrb[2].mxu1 }
 0x3b1   :  { %v545_v28 = vadd.f32 %v1876_v23, %v544_v27  ;;  %v1976_v29 = vpop.f32.mrb[3].mxu1  ;;  %v548_v30 = vmax.f32 %v542_v25, 0.0  ;;  %v713_v23 = vpack.c.bf16 %v658_v22, %v657_v21  ;;  %v1887_v22 = vld [vmem:[#allocation20] ss:$0 sm:$0xff] }
 0x3b3   :  { %v549_v31 = vmax.f32 %v545_v28, 0.0 }
 0x3b5   :  { %v550_v32 = vpack.c.bf16 %v549_v31, %v548_v30  ;;  %v660_v31 = vld [vmem:[#allocation17] sm:$0xff] }
 0x3b7   :  { %1982 = vmatmul.mubr.msk.bf16.vlgmr.msra.gmra.mrb[4].mxu0 %vm559_vm4, %v550_v32  ;;  %v661_v32 = vld [vmem:[#allocation17 + $0x8] sm:$0xff] }
 0x3b8   :  { %1995 = vmatprep.mubr.msk.bf16.mxu0 %vm2814_vm0, %v2813_v0  ;;  %1992 = vmatpush3.bf16.msra.mxu0 %v712_v20 }
 0x3b9   :  { %1993 = vmatprep.subr.bf16.mxu0 %v2813_v0 }
 0x3bc   :  { %1994 = vmatpush3.bf16.msra.mxu0 %v713_v23 }
 0x3bd   :  { %2007 = vmatprep.subr.bf16.mxu0 %v2813_v0 }
 0x48a   :  { %v597_v34 = vpop.f32.mrb[4].mxu0 }
 0x48b   :  { %v598_v35 = vadd.f32 %v1878_v33, %v597_v34  ;;  %v1983_v36 = vpop.f32.mrb[5].mxu0  ;;  %v662_v34 = vld [vmem:[#allocation17 + $0x10] sm:$0xff] }
 0x48c   :  { %v600_v37 = vpop.f32.mrb[6].mxu0 }
 0x48d   :  { %v604_v38 = vmax.f32 %v598_v35, 0.0  ;;  %v601_v39 = vadd.f32 %v1878_v33, %v600_v37  ;;  %v1984_v40 = vpop.f32.mrb[7].mxu0  ;;  %v767_v33 = vpack.c.bf16 %v661_v32, %v660_v31  ;;  %v663_v35 = vld [vmem:[#allocation17 + $0x18] sm:$0xff]  ;;  %v879_v32 = vld [vmem:[#allocation23] sm:$0xff] }
 0x48e   :  { %v768_v36 = vpack.c.bf16 %v663_v35, %v662_v34  ;;  %v1883_v37 = vld [vmem:[#allocation15] ss:$0 sm:$0xff]  ;;  %v881_v35 = vld [vmem:[#allocation23 + $0x10] sm:$0xff] }
 0x48f   :  { %v615_v41 = vmul.f32 %v604_v38, %v604_v38  ;;  %v605_v42 = vmax.f32 %v601_v39, 0.0  ;;  %v606_v43 = vsel %vm559_vm4, %v604_v38, 0.0 }
 0x491   :  { %v607_v44 = vsel %vm559_vm4, %v605_v42, 0.0  ;;  %v616_v45 = vmul.f32 %v605_v42, %v605_v42  ;;  %v617_v47 = vsel %vm559_vm4, %v615_v41, 0.0 }
 0x492   :  { %v608_v46 = vadd.f32 %v607_v44, %v606_v43 }
 0x493   :  { %v618_v48 = vsel %vm559_vm4, %v616_v45, 0.0 }
 0x494   :  { %v609_v49 = vrot.slane %v608_v46, 4  ;;  %v619_v50 = vadd.f32 %v618_v48, %v617_v47  ;;  %v1885_v47 = vld [vmem:[#allocation18] ss:$0 sm:$0xff] }
 0x496   :  { %v610_v51 = vadd.f32 %v609_v49, %v608_v46  ;;  %v620_v52 = vrot.slane %v619_v50, 4 }
 0x498   :  { %v611_v53 = vrot.slane %v610_v51, 2  ;;  %v621_v54 = vadd.f32 %v620_v52, %v619_v50 }
 0x49a   :  { %v612_v55 = vadd.f32 %v611_v53, %v610_v51  ;;  %v622_v56 = vrot.slane %v621_v54, 2 }
 0x49c   :  { %v613_v57 = vrot.slane %v612_v55, 1  ;;  %v623_v58 = vadd.f32 %v622_v56, %v621_v54 }
 0x49e   :  { %v614_v59 = vadd.f32 %v613_v57, %v612_v55  ;;  %v624_v60 = vrot.slane %v623_v58, 1 }
 0x4a0   :  { %v625_v61 = vadd.f32 %v624_v60, %v623_v58  ;;  %v626_v62 = vmul.f32 0.0625, %v614_v59 }
 0x4a2   :  { %v627_v63 = vmul.f32 0.0625, %v625_v61  ;;  %v628_v1 = vmul.f32 %v626_v62, %v626_v62  ;;  %v633_v2 = vsub.f32 %v604_v38, %v626_v62  ;;  %v634_v3 = vsub.f32 %v605_v42, %v626_v62 }
 0x4a4   :  { %v629_v4 = vsub.f32 %v627_v63, %v628_v1  ;;  %v641_v9 = vmul.f32 %v1880_v8, %v633_v2  ;;  %v642_v10 = vmul.f32 %v1880_v8, %v634_v3 }
 0x4a6   :  { %v630_v5 = vmax.f32 %v629_v4, 0.0 }
 0x4a8   :  { %v631_v7 = vadd.f32 1e-05, %v630_v5 }
 0x4aa   :  { %2176 = vrsqrt.f32 %v631_v7 }
 0x4b4   :  { %v2177_v11 = vpop.eup %2176 }
 0x4b5   :  { %v643_v13 = vmul.f32 %v2177_v11, %v641_v9  ;;  %v644_v14 = vmul.f32 %v2177_v11, %v642_v10 }
 0x4b7   :  { %v652_v15 = vadd.f32 %v1881_v12, %v644_v14  ;;  %v651_v16 = vadd.f32 %v1881_v12, %v643_v13 }
 0x4b9   :  { %654 = vst.msk [vmem:[#allocation2 + $0x8] sm:$0xff] %vm559_vm4, %v652_v15  ;;  %v667_v17 = vpack.c.bf16 %v652_v15, %v651_v16  ;;  %653 = vst.msk [vmem:[#allocation2] sm:$0xff] %vm559_vm4, %v651_v16 }
 0x4bb   :  { %1986 = vmatpush3.bf16.msra.mxu1 %v667_v17 }
 0x4bc   :  { %1999 = vmatprep.subr.bf16.mxu1 %v2813_v0 }
 0x4be   :  { %1988 = vmatmul.mubr.msk.bf16.vlgmr.msra.gmra.mrb[4].mxu1 %vm444_vm1, %v3123_v6 }
 0x4bf   :  { %2003 = vmatprep.mubr.msk.bf16.mxu1 %vm2814_vm0, %v2813_v0  ;;  %2000 = vmatpush3.bf16.msra.mxu1 %v767_v33  ;;  %v880_v33 = vld [vmem:[#allocation23 + $0x8] sm:$0xff] }
 0x4c0   :  { %2001 = vmatprep.subr.bf16.mxu1 %v2813_v0  ;;  %v936_v34 = vpack.c.bf16 %v880_v33, %v879_v32 }
 0x4c3   :  { %2002 = vmatpush3.bf16.msra.mxu1 %v768_v36  ;;  %v882_v36 = vld [vmem:[#allocation23 + $0x18] sm:$0xff] }
 0x4c4   :  { %2013 = vmatprep.subr.bf16.mxu1 %v2813_v0 }
 0x591   :  { %v702_v24 = vpop.f32.mrb[4].mxu1 }
 0x592   :  { %v1989_v25 = vpop.f32.mrb[5].mxu1  ;;  %v709_v27 = vadd.f32 %v702_v24, %v651_v16 }
 0x593   :  { %v705_v26 = vpop.f32.mrb[6].mxu1 }
 0x594   :  { %v710_v28 = vadd.f32 %v705_v26, %v652_v15  ;;  %v1990_v29 = vpop.f32.mrb[7].mxu1  ;;  %v1888_v26 = vld [vmem:[#allocation21] ss:$0 sm:$0xff] }
 0x596   :  { %v711_v30 = vpack.c.bf16 %v710_v28, %v709_v27 }
 0x598   :  { %1996 = vmatmul.mubr.msk.bf16.vlgmr.msra.gmra.mrb[8].mxu0 %vm559_vm4, %v711_v30 }
 0x599   :  { %2009 = vmatprep.mubr.msk.bf16.mxu0 %vm2814_vm0, %v2813_v0 }
 0x66b   :  { %v757_v38 = vpop.f32.mrb[8].mxu0 }
 0x66c   :  { %v758_v39 = vadd.f32 %v1883_v37, %v757_v38  ;;  %v1997_v40 = vpop.f32.mrb[9].mxu0 }
 0x66d   :  { %v760_v41 = vpop.f32.mrb[10].mxu0 }
 0x66e   :  { %v761_v42 = vadd.f32 %v1883_v37, %v760_v41  ;;  %v1998_v43 = vpop.f32.mrb[11].mxu0  ;;  %v764_v44 = vmax.f32 %v758_v39, 0.0  ;;  %v937_v37 = vpack.c.bf16 %v882_v36, %v881_v35 }
 0x670   :  { %v765_v45 = vmax.f32 %v761_v42, 0.0 }
 0x672   :  { %v766_v46 = vpack.c.bf16 %v765_v45, %v764_v44 }
 0x674   :  { %2004 = vmatmul.mubr.msk.bf16.vlgmr.msra.gmra.mrb[8].mxu1 %vm559_vm4, %v766_v46  ;;  %v884_v46 = vld [vmem:[#allocation26] sm:$0xff] }
 0x675   :  { %2017 = vmatprep.mubr.msk.bf16.mxu1 %vm2814_vm0, %v2813_v0  ;;  %2014 = vmatpush3.bf16.msra.mxu1 %v936_v34 }
 0x676   :  { %2015 = vmatprep.subr.bf16.mxu1 %v2813_v0 }
 0x679   :  { %2016 = vmatpush3.bf16.msra.mxu1 %v937_v37  ;;  %v1894_v37 = vld [vmem:[#allocation29] ss:$0 sm:$0xff] }
 0x67a   :  { %2029 = vmatprep.subr.bf16.mxu1 %v2813_v0 }
 0x747   :  { %v812_v48 = vpop.f32.mrb[8].mxu1 }
 0x748   :  { %v813_v49 = vadd.f32 %v1885_v47, %v812_v48  ;;  %v2005_v50 = vpop.f32.mrb[9].mxu1 }
 0x749   :  { %v815_v51 = vpop.f32.mrb[10].mxu1  ;;  %v887_v50 = vld [vmem:[#allocation26 + $0x18] sm:$0xff] }
 0x74a   :  { %v819_v52 = vmax.f32 %v813_v49, 0.0  ;;  %v816_v53 = vadd.f32 %v1885_v47, %v815_v51  ;;  %v2006_v54 = vpop.f32.mrb[11].mxu1  ;;  %v885_v47 = vld [vmem:[#allocation26 + $0x8] sm:$0xff]  ;;  %v886_v49 = vld [vmem:[#allocation26 + $0x10] sm:$0xff] }
 0x74b   :  { %v991_v48 = vpack.c.bf16 %v885_v47, %v884_v46  ;;  %v992_v51 = vpack.c.bf16 %v887_v50, %v886_v49  ;;  %v1154_v46 = vld [vmem:[#allocation32 + $0x18] sm:$0xff]  ;;  %v1151_v47 = vld [vmem:[#allocation32] sm:$0xff]  ;;  %v1153_v49 = vld [vmem:[#allocation32 + $0x10] sm:$0xff] }
 0x74c   :  { %v830_v55 = vmul.f32 %v819_v52, %v819_v52  ;;  %v820_v56 = vmax.f32 %v816_v53, 0.0  ;;  %v821_v57 = vsel %vm559_vm4, %v819_v52, 0.0  ;;  %v1156_v50 = vld [vmem:[#allocation32 + $0x28] sm:$0xff] }
 0x74e   :  { %v822_v58 = vsel %vm559_vm4, %v820_v56, 0.0  ;;  %v831_v59 = vmul.f32 %v820_v56, %v820_v56  ;;  %v832_v61 = vsel %vm559_vm4, %v830_v55, 0.0 }
 0x74f   :  { %v823_v60 = vadd.f32 %v822_v58, %v821_v57 }
 0x750   :  { %v833_v62 = vsel %vm559_vm4, %v831_v59, 0.0 }
 0x751   :  { %v824_v63 = vrot.slane %v823_v60, 4  ;;  %v834_v1 = vadd.f32 %v833_v62, %v832_v61  ;;  %v1892_v62 = vld [vmem:[#allocation27] ss:$0 sm:$0xff] }
 0x753   :  { %v825_v2 = vadd.f32 %v824_v63, %v823_v60  ;;  %v835_v3 = vrot.slane %v834_v1, 4 }
 0x755   :  { %v826_v4 = vrot.slane %v825_v2, 2  ;;  %v836_v5 = vadd.f32 %v835_v3, %v834_v1 }
 0x757   :  { %v827_v7 = vadd.f32 %v826_v4, %v825_v2  ;;  %v837_v8 = vrot.slane %v836_v5, 2 }
 0x759   :  { %v828_v9 = vrot.slane %v827_v7, 1  ;;  %v838_v10 = vadd.f32 %v837_v8, %v836_v5 }
 0x75b   :  { %v829_v11 = vadd.f32 %v828_v9, %v827_v7  ;;  %v839_v12 = vrot.slane %v838_v10, 1 }
 0x75d   :  { %v840_v13 = vadd.f32 %v839_v12, %v838_v10  ;;  %v841_v14 = vmul.f32 0.0625, %v829_v11 }
 0x75f   :  { %v842_v15 = vmul.f32 0.0625, %v840_v13  ;;  %v843_v16 = vmul.f32 %v841_v14, %v841_v14  ;;  %v849_v17 = vsub.f32 %v820_v56, %v841_v14  ;;  %v848_v18 = vsub.f32 %v819_v52, %v841_v14  ;;  %v1890_v52 = vld [vmem:[#allocation24] ss:$0 sm:$0xff] }
 0x761   :  { %v844_v19 = vsub.f32 %v842_v15, %v843_v16  ;;  %v857_v23 = vmul.f32 %v1887_v22, %v849_v17  ;;  %v856_v24 = vmul.f32 %v1887_v22, %v848_v18 }
 0x763   :  { %v845_v20 = vmax.f32 %v844_v19, 0.0 }
 0x765   :  { %v846_v21 = vadd.f32 1e-05, %v845_v20 }
 0x767   :  { %2178 = vrsqrt.f32 %v846_v21 }
 0x771   :  { %v2179_v25 = vpop.eup %2178 }
 0x772   :  { %v858_v27 = vmul.f32 %v2179_v25, %v856_v24  ;;  %v859_v28 = vmul.f32 %v2179_v25, %v857_v23 }
 0x774   :  { %v866_v29 = vadd.f32 %v1888_v26, %v858_v27  ;;  %v867_v30 = vadd.f32 %v1888_v26, %v859_v28 }
 0x776   :  { %870 = vrot.lane.b32.xlu0 %v866_v29, %s2815_s5  ;;  %v891_v31 = vpack.c.bf16 %v867_v30, %v866_v29 }
 0x778   :  { %2008 = vmatpush3.bf16.msra.mxu0 %v891_v31 }
 0x779   :  { %2021 = vmatprep.subr.bf16.mxu0 %v2813_v0 }
 0x77a   :  { %872 = vrot.lane.b32.xlu0 %v867_v30, %s2815_s5 }
 0x77b   :  { %2010 = vmatmul.mubr.msk.bf16.vlgmr.msra.gmra.mrb[12].mxu0 %vm444_vm1, %v3123_v6 }
 0x77c   :  { %2025 = vmatprep.mubr.msk.bf16.mxu0 %vm2814_vm0, %v2813_v0  ;;  %2022 = vmatpush3.bf16.msra.mxu0 %v991_v48 }
 0x77d   :  { %2023 = vmatprep.subr.bf16.mxu0 %v2813_v0 }
 0x780   :  { %2024 = vmatpush3.bf16.msra.mxu0 %v992_v51  ;;  %v1158_v51 = vld [vmem:[#allocation32 + $0x38] sm:$0xff] }
 0x7e8   :  { %v871_v38 = vpop.permute.xlu0 %870 }
 0x7e9   :  { %877 = vst.msk [vmem:[#allocation2] sm:$0xff] %vm876_vm5, %v871_v38 }
 0x7ec   :  { %v873_v39 = vpop.permute.xlu0 %872 }
 0x7ed   :  { %878 = vst.msk [vmem:[#allocation2 + $0x8] sm:$0xff] %vm876_vm5, %v873_v39 }
 0x84e   :  { %v926_v6 = vpop.f32.mrb[12].mxu0 }
 0x84f   :  { %v2011_v40 = vpop.f32.mrb[13].mxu0  ;;  %v933_v42 = vadd.f32 %v926_v6, %v866_v29 }
 0x850   :  { %v929_v41 = vpop.f32.mrb[14].mxu0  ;;  %v1895_v40 = vld [vmem:[#allocation30] ss:$0 sm:$0xff] }
 0x851   :  { %v934_v43 = vadd.f32 %v929_v41, %v867_v30  ;;  %v2012_v44 = vpop.f32.mrb[15].mxu0 }
 0x853   :  { %v935_v45 = vpack.c.bf16 %v934_v43, %v933_v42 }
 0x855   :  { %2018 = vmatmul.mubr.msk.bf16.vlgmr.msra.gmra.mrb[12].mxu1 %vm559_vm4, %v935_v45  ;;  %v1152_v45 = vld [vmem:[#allocation32 + $0x8] sm:$0xff] }
 0x856   :  { %2031 = vmatprep.mubr.msk.bf16.mxu1 %vm2814_vm0, %v2813_v0  ;;  %v1255_v48 = vpack.c.bf16 %v1154_v46, %v1152_v45  ;;  %v1186_v46 = vld [vmem:[%s3330_s28 + $0x50] sm:$0xff] }
 0x858   :  { %1281 = vmatprep.subr.bf16.mxu0 %v1255_v48 }
 0x928   :  { %v981_v53 = vpop.f32.mrb[12].mxu1 }
 0x929   :  { %v982_v54 = vadd.f32 %v1890_v52, %v981_v53  ;;  %v2019_v55 = vpop.f32.mrb[13].mxu1  ;;  %v1257_v53 = vpack.c.bf16 %v1158_v51, %v1156_v50  ;;  %v1205_v50 = vld [vmem:[#allocation35 + $0x18] sm:$0xff] }
 0x92a   :  { %v984_v56 = vpop.f32.mrb[14].mxu1  ;;  %v1157_v55 = vld [vmem:[#allocation32 + $0x30] sm:$0xff] }
 0x92b   :  { %v985_v57 = vadd.f32 %v1890_v52, %v984_v56  ;;  %v2020_v58 = vpop.f32.mrb[15].mxu1  ;;  %v988_v59 = vmax.f32 %v982_v54, 0.0  ;;  %v1254_v52 = vpack.c.bf16 %v1153_v49, %v1151_v47  ;;  %v1155_v54 = vld [vmem:[#allocation32 + $0x20] sm:$0xff]  ;;  %v1160_v56 = vld [vmem:[#allocation32 + $0x48] sm:$0xff] }
 0x92c   :  { %v1256_v58 = vpack.c.bf16 %v1157_v55, %v1155_v54  ;;  %v1187_v47 = vld [vmem:[%s3330_s28 + $0x58] sm:$0xff]  ;;  %v1189_v54 = vld [vmem:[#allocation33] sm:$0xff] }
 0x92d   :  { %v989_v60 = vmax.f32 %v985_v57, 0.0  ;;  %v1162_v57 = vld [vmem:[#allocation32 + $0x58] sm:$0xff]  ;;  %v1329_v48 = vpack.c.bf16 %v1187_v47, %v1186_v46  ;;  %v1203_v49 = vld [vmem:[#allocation35 + $0x8] sm:$0xff]  ;;  %v1222_v47 = vld [vmem:[#allocation35 + $0xa0] sm:$0xff] }
 0x92e   :  { %v1447_v51 = vpack.c.bf16 %v1205_v50, %v1203_v49  ;;  %v1190_v55 = vld [vmem:[#allocation33 + $0x8] sm:$0xff]  ;;  %v1197_v50 = vld [vmem:[#allocation33 + $0x40] sm:$0xff] }
 0x92f   :  { %v990_v61 = vpack.c.bf16 %v989_v60, %v988_v59  ;;  %v1259_v59 = vpack.c.bf16 %v1162_v57, %v1160_v56  ;;  %v1159_v60 = vld [vmem:[#allocation32 + $0x40] sm:$0xff]  ;;  %v1191_v56 = vld [vmem:[#allocation33 + $0x10] sm:$0xff]  ;;  %v1381_v57 = vpack.c.bf16 %v1190_v55, %v1189_v54  ;;  %v1200_v55 = vld [vmem:[#allocation33 + $0x58] sm:$0xff] }
 0x930   :  { %v1199_v54 = vld [vmem:[#allocation33 + $0x50] sm:$0xff] }
 0x931   :  { %2026 = vmatmul.mubr.msk.bf16.vlgmr.msra.gmra.mrb[16].mxu0 %vm559_vm4, %v990_v61  ;;  %v1161_v61 = vld [vmem:[#allocation32 + $0x50] sm:$0xff] }
 0x932   :  { %1282 = vmatpush1.bf16.msra.mxu0 %v1254_v52  ;;  %v1267_v52 = vlaneseq }
 0x933   :  { %1283 = vmatprep.subr.bf16.mxu0 %v1257_v53 }
 0x934   :  { %v3215_v53 = vshrl.u32 %v1267_v52, 7 }
 0x936   :  { %1284 = vmatpush1.bf16.msra.mxu0 %v1256_v58  ;;  %v1192_v58 = vld [vmem:[#allocation33 + $0x18] sm:$0xff] }
 0x937   :  { %1285 = vmatprep.subr.bf16.mxu0 %v1259_v59  ;;  %v1269_v59 = vsub.s32 0, %v3215_v53 }
 0xa04   :  { %v1036_v63 = vpop.f32.mrb[16].mxu0 }
 0xa05   :  { %v1037_v1 = vadd.f32 %v1892_v62, %v1036_v63  ;;  %v2027_v2 = vpop.f32.mrb[17].mxu0  ;;  %v1166_v63 = vld [vmem:[#allocation32 + $0x78] sm:$0xff] }
 0xa06   :  { %v1039_v3 = vpop.f32.mrb[18].mxu0 }
 0xa07   :  { %v1043_v4 = vmax.f32 %v1037_v1, 0.0  ;;  %v1040_v5 = vadd.f32 %v1892_v62, %v1039_v3  ;;  %v2028_v7 = vpop.f32.mrb[19].mxu0  ;;  %v1164_v62 = vld [vmem:[#allocation32 + $0x68] sm:$0xff]  ;;  %v1258_v1 = vpack.c.bf16 %v1161_v61, %v1159_v60  ;;  %v1163_v3 = vld [vmem:[#allocation32 + $0x60] sm:$0xff]  ;;  %v1175_v60 = vld [vmem:[%s3331_s13] sm:$0x3] }
 0xa08   :  { %v1261_v2 = vpack.c.bf16 %v1166_v63, %v1164_v62  ;;  %v1170_v7 = vld [vmem:[#allocation32 + $0x98] sm:$0xff]  ;;  %v1273_v61 = vsub.s32 1, %v3215_v53  ;;  %v1382_v62 = vpack.c.bf16 %v1192_v58, %v1191_v56  ;;  %v1193_v63 = vld [vmem:[#allocation33 + $0x20] sm:$0xff]  ;;  %v1386_v56 = vpack.c.bf16 %v1200_v55, %v1199_v54 }
 0xa09   :  { %v1054_v8 = vmul.f32 %v1043_v4, %v1043_v4  ;;  %v1044_v9 = vmax.f32 %v1040_v5, 0.0  ;;  %v1045_v10 = vsel %vm559_vm4, %v1043_v4, 0.0  ;;  %v1168_v5 = vld [vmem:[#allocation32 + $0x88] sm:$0xff]  ;;  %1286 = vmatpush1.bf16.msra.mxu0 %v1258_v1 }
 0xa0a   :  { %1287 = vmatprep.subr.bf16.mxu0 %v1261_v2  ;;  %v1194_v1 = vld [vmem:[#allocation33 + $0x28] sm:$0xff]  ;;  %v1270_v2 = vrot.slane %v1175_v60, %v1269_v59 }
 0xa0b   :  { %v1046_v11 = vsel %vm559_vm4, %v1044_v9, 0.0  ;;  %v1055_v12 = vmul.f32 %v1044_v9, %v1044_v9  ;;  %v1056_v14 = vsel %vm559_vm4, %v1054_v8, 0.0 }
 0xa0c   :  { %v1047_v13 = vadd.f32 %v1046_v11, %v1045_v10  ;;  %v1167_v10 = vld [vmem:[#allocation32 + $0x80] sm:$0xff]  ;;  %v1169_v11 = vld [vmem:[#allocation32 + $0x90] sm:$0xff] }
 0xa0d   :  { %v1057_v15 = vsel %vm559_vm4, %v1055_v12, 0.0  ;;  %v1172_v12 = vld [vmem:[#allocation32 + $0xa8] sm:$0xff] }
 0xa0e   :  { %v1048_v16 = vrot.slane %v1047_v13, 4  ;;  %v1058_v17 = vadd.f32 %v1057_v15, %v1056_v14  ;;  %v1262_v14 = vpack.c.bf16 %v1169_v11, %v1167_v10  ;;  %v1202_v11 = vld [vmem:[#allocation35] sm:$0xff] }
 0xa10   :  { %v1049_v18 = vadd.f32 %v1048_v16, %v1047_v13  ;;  %v1059_v19 = vrot.slane %v1058_v17, 4  ;;  %v1174_v13 = vld [vmem:[#allocation32 + $0xb8] sm:$0xff] }
 0xa11   :  { %v1265_v15 = vpack.c.bf16 %v1174_v13, %v1172_v12  ;;  %v1204_v12 = vld [vmem:[#allocation35 + $0x10] sm:$0xff] }
 0xa12   :  { %v1050_v20 = vrot.slane %v1049_v18, 2  ;;  %v1060_v21 = vadd.f32 %v1059_v19, %v1058_v17 }
 0xa14   :  { %v1051_v22 = vadd.f32 %v1050_v20, %v1049_v18  ;;  %v1061_v23 = vrot.slane %v1060_v21, 2  ;;  %v1105_v18 = vld [vmem:[%s3329_s26] sm:$0x3] }
 0xa16   :  { %v1052_v24 = vrot.slane %v1051_v22, 1  ;;  %v1062_v25 = vadd.f32 %v1061_v23, %v1060_v21  ;;  %v1171_v23 = vld [vmem:[#allocation32 + $0xa0] sm:$0xff] }
 0xa18   :  { %v1053_v26 = vadd.f32 %v1052_v24, %v1051_v22  ;;  %v1063_v27 = vrot.slane %v1062_v25, 1  ;;  %v1106_v22 = vpack.c.bf16 %v1105_v18, %v1105_v18  ;;  %v1173_v24 = vld [vmem:[#allocation32 + $0xb0] sm:$0xff] }
 0xa1a   :  { %v1064_v28 = vadd.f32 %v1063_v27, %v1062_v25  ;;  %v1065_v29 = vmul.f32 0.0625, %v1053_v26  ;;  %v1264_v25 = vpack.c.bf16 %v1173_v24, %v1171_v23  ;;  %v2817_v26 = vmov 0   ;;  %v1176_v27 = vld [vmem:[%s3330_s28] sm:$0xff]  ;;  %v1206_v24 = vld [vmem:[#allocation35 + $0x20] sm:$0xff] }
 0xa1b   :  { %1313 = vmatprep.mubr.bf16.mxu0 %v2817_v26 }
 0xa1c   :  { %v1066_v30 = vmul.f32 0.0625, %v1064_v28  ;;  %v1067_v31 = vmul.f32 %v1065_v29, %v1065_v29  ;;  %v1073_v32 = vsub.f32 %v1044_v9, %v1065_v29  ;;  %v1072_v33 = vsub.f32 %v1043_v4, %v1065_v29  ;;  %v1165_v4 = vld [vmem:[#allocation32 + $0x70] sm:$0xff]  ;;  %v1177_v28 = vld [vmem:[%s3330_s28 + $0x8] sm:$0xff]  ;;  %v1178_v29 = vld [vmem:[%s3330_s28 + $0x10] sm:$0xff] }
 0xa1d   :  { %v1260_v8 = vpack.c.bf16 %v1165_v4, %v1163_v3  ;;  %v1263_v9 = vpack.c.bf16 %v1170_v7, %v1168_v5  ;;  %v1274_v3 = vrot.slane %v1175_v60, %v1273_v61  ;;  %v1383_v4 = vpack.c.bf16 %v1194_v1, %v1193_v63  ;;  %v1195_v5 = vld [vmem:[#allocation33 + $0x30] sm:$0xff]  ;;  %v1196_v7 = vld [vmem:[#allocation33 + $0x38] sm:$0xff]  ;;  %v1228_v63 = vld [vmem:[#allocation36 + $0x8] sm:$0xff] }
 0xa1e   :  { %v1068_v34 = vsub.f32 %v1066_v30, %v1067_v31  ;;  %v1080_v38 = vmul.f32 %v1894_v37, %v1072_v33  ;;  %v1081_v39 = vmul.f32 %v1894_v37, %v1073_v32  ;;  %v1324_v30 = vpack.c.bf16 %v1177_v28, %v1176_v27  ;;  %v1179_v31 = vld [vmem:[%s3330_s28 + $0x18] sm:$0xff]  ;;  %v1180_v33 = vld [vmem:[%s3330_s28 + $0x20] sm:$0xff]  ;;  %v1213_v28 = vld [vmem:[#allocation35 + $0x58] sm:$0xff] }
 0xa1f   :  { %1288 = vmatpush1.bf16.msra.mxu0 %v1260_v8  ;;  %v1325_v32 = vpack.c.bf16 %v1179_v31, %v1178_v29  ;;  %v1183_v37 = vld [vmem:[%s3330_s28 + $0x38] sm:$0xff]  ;;  %v1210_v31 = vld [vmem:[#allocation35 + $0x40] sm:$0xff] }
 0xa20   :  { %v1069_v35 = vmax.f32 %v1068_v34, 0.0  ;;  %1289 = vmatprep.subr.bf16.mxu0 %v1263_v9  ;;  %v1181_v34 = vld [vmem:[%s3330_s28 + $0x28] sm:$0xff]  ;;  %v1211_v27 = vld [vmem:[#allocation35 + $0x48] sm:$0xff] }
 0xa22   :  { %v1070_v36 = vadd.f32 1e-05, %v1069_v35  ;;  %v1326_v35 = vpack.c.bf16 %v1181_v34, %v1180_v33  ;;  %v1215_v33 = vld [vmem:[#allocation35 + $0x68] sm:$0xff]  ;;  %v1217_v34 = vld [vmem:[#allocation35 + $0x78] sm:$0xff] }
 0xa23   :  { %1290 = vmatpush1.bf16.msra.mxu0 %v1262_v14 }
 0xa24   :  { %2180 = vrsqrt.f32 %v1070_v36  ;;  %1291 = vmatprep.subr.bf16.mxu0 %v1265_v15  ;;  %v1182_v36 = vld [vmem:[%s3330_s28 + $0x30] sm:$0xff]  ;;  %v1207_v15 = vld [vmem:[#allocation35 + $0x28] sm:$0xff] }
 0xa27   :  { %1292 = vmatpush1.bf16.msra.mxu0 %v1264_v25  ;;  %v1208_v25 = vld [vmem:[#allocation35 + $0x30] sm:$0xff] }
 0xa28   :  { %2051 = vmatprep.subr.bf16.mxu0 %v2813_v0  ;;  %v1448_v29 = vpack.c.bf16 %v1208_v25, %v1206_v24 }
 0xa2e   :  { %v2181_v6 = vpop.eup %2180 }
 0xa2f   :  { %v1082_v41 = vmul.f32 %v2181_v6, %v1080_v38  ;;  %v1083_v42 = vmul.f32 %v2181_v6, %v1081_v39  ;;  %v1327_v38 = vpack.c.bf16 %v1183_v37, %v1182_v36  ;;  %v1184_v39 = vld [vmem:[%s3330_s28 + $0x40] sm:$0xff]  ;;  %v1185_v6 = vld [vmem:[%s3330_s28 + $0x48] sm:$0xff]  ;;  %v1453_v36 = vpack.c.bf16 %v1217_v34, %v1215_v33  ;;  %v1214_v37 = vld [vmem:[#allocation35 + $0x60] sm:$0xff] }
 0xa31   :  { %v1090_v43 = vadd.f32 %v1895_v40, %v1082_v41  ;;  %v1091_v44 = vadd.f32 %v1895_v40, %v1083_v42  ;;  %v1328_v40 = vpack.c.bf16 %v1185_v6, %v1184_v39  ;;  %v1219_v39 = vld [vmem:[#allocation35 + $0x88] sm:$0xff]  ;;  %v1221_v6 = vld [vmem:[#allocation35 + $0x98] sm:$0xff] }
 0xa33   :  { %1094 = vrot.lane.b32.xlu1 %v1090_v43, %s2816_s23 }
 0xa37   :  { %1096 = vrot.lane.b32.xlu1 %v1091_v44, %s2816_s23 }
 0xaa5   :  { %v1095_v16 = vpop.permute.xlu1 %1094 }
 0xaa6   :  { %1101 = vst.msk [vmem:[#allocation2] sm:$0xff] %vm1100_vm6, %v1095_v16  ;;  %v1209_v16 = vld [vmem:[#allocation35 + $0x38] sm:$0xff] }
 0xaa7   :  { %v1449_v23 = vpack.c.bf16 %v1209_v16, %v1207_v15  ;;  %v1235_v16 = vld [vmem:[#allocation36 + $0x40] sm:$0xff] }
 0xaa9   :  { %v1097_v17 = vpop.permute.xlu1 %1096 }
 0xaaa   :  { %1102 = vst.msk [vmem:[#allocation2 + $0x8] sm:$0xff] %vm1100_vm6, %v1097_v17  ;;  %v1384_v17 = vpack.c.bf16 %v1196_v7, %v1195_v5  ;;  %v1229_v7 = vld [vmem:[#allocation36 + $0x10] sm:$0xff] }
 0xaad   :  { %v1103_v19 = vld [vmem:[#allocation2] sm:$0xff] }
 0xab1   :  { %v1104_v20 = vld [vmem:[#allocation2 + $0x8] sm:$0xff] }
 0xab2   :  { %v3186_v21 = vpack.c.bf16 %v1104_v20, %v1103_v19  ;;  %v1446_v20 = vpack.c.bf16 %v1204_v12, %v1202_v11  ;;  %v1232_v11 = vld [vmem:[#allocation36 + $0x28] sm:$0xff] }
 0xab4   :  { %2030 = vmatpush3.bf16.msra.mxu1 %v3186_v21 }
 0xab5   :  { %2035 = vmatprep.subr.bf16.mxu1 %v2813_v0 }
 0xab7   :  { %2032 = vmatmul.mubr.msk.bf16.vlgmr.msra.gmra.mrb[16].mxu1 %vm444_vm1, %v1106_v22 }
 0xab8   :  { %2047 = vmatprep.mubr.msk.bf16.mxu1 %vm2814_vm0, %v2813_v0  ;;  %2036 = vmatpush3.bf16.msra.mxu1 %v1324_v30  ;;  %v1451_v30 = vpack.c.bf16 %v1213_v28, %v1211_v27 }
 0xab9   :  { %2037 = vmatprep.subr.bf16.mxu1 %v2813_v0 }
 0xabc   :  { %2038 = vmatpush3.bf16.msra.mxu1 %v1325_v32  ;;  %v1212_v32 = vld [vmem:[#allocation35 + $0x50] sm:$0xff] }
 0xabd   :  { %2039 = vmatprep.subr.bf16.mxu1 %v2813_v0 }
 0xac0   :  { %2040 = vmatpush3.bf16.msra.mxu1 %v1326_v35  ;;  %v1450_v35 = vpack.c.bf16 %v1212_v32, %v1210_v31 }
 0xac1   :  { %2041 = vmatprep.subr.bf16.mxu1 %v2813_v0 }
 0xac4   :  { %2042 = vmatpush3.bf16.msra.mxu1 %v1327_v38  ;;  %v1216_v38 = vld [vmem:[#allocation35 + $0x70] sm:$0xff] }
 0xac5   :  { %2043 = vmatprep.subr.bf16.mxu1 %v2813_v0 }
 0xac8   :  { %2044 = vmatpush3.bf16.msra.mxu1 %v1328_v40  ;;  %v1452_v40 = vpack.c.bf16 %v1216_v38, %v1214_v37  ;;  %v1242_v38 = vld [vmem:[#allocation38 + $0x10] sm:$0xff] }
 0xac9   :  { %2045 = vmatprep.subr.bf16.mxu1 %v2813_v0 }
 0xacc   :  { %2046 = vmatpush3.bf16.msra.mxu1 %v1329_v48  ;;  %v1224_v48 = vld [vmem:[#allocation35 + $0xb0] sm:$0xff] }
 0xacd   :  { %1472 = vmatprep.subr.bf16.mxu1 %v1447_v51  ;;  %v1456_v49 = vpack.c.bf16 %v1224_v48, %v1222_v47  ;;  %v1198_v51 = vld [vmem:[#allocation33 + $0x48] sm:$0xff]  ;;  %v1250_v48 = vld [vmem:[#allocation38 + $0x50] sm:$0xff] }
 0xace   :  { %v1385_v52 = vpack.c.bf16 %v1198_v51, %v1197_v50  ;;  %v1900_v51 = vld [vmem:[%s3334_s2] ss:$0 sm:$0xff] }
 0xb8a   :  { %v1145_v41 = vpop.f32.mrb[16].mxu1 }
 0xb8b   :  { %v1253_v42 = vpack.c.bf16 %v1145_v41, %v1145_v41  ;;  %v2033_v43 = vpop.f32.mrb[17].mxu1  ;;  %v1455_v41 = vpack.c.bf16 %v1221_v6, %v1219_v39  ;;  %v1243_v39 = vld [vmem:[#allocation38 + $0x18] sm:$0xff] }
 0xb8c   :  { %v1148_v44 = vpop.f32.mrb[18].mxu1  ;;  %v1223_v43 = vld [vmem:[#allocation35 + $0xa8] sm:$0xff]  ;;  %v1578_v6 = vpack.c.bf16 %v1243_v39, %v1242_v38 }
 0xb8d   :  { %1897 = vmatmul.mubr.msk.bf16.vlgmr.msra.gmra.mrb[20].mxu0 %vm1277_vm7, %v1253_v42  ;;  %v2034_v45 = vpop.f32.mrb[19].mxu1  ;;  %v1218_v42 = vld [vmem:[#allocation35 + $0x80] sm:$0xff]  ;;  %v1225_v44 = vld [vmem:[#allocation35 + $0xb8] sm:$0xff] }
 0xb8e   :  { %2063 = vmatprep.mubr.msk.bf16.mxu0 %vm2814_vm0, %v2813_v0  ;;  %2052 = vmatpush3.bf16.msra.mxu0 %v1381_v57  ;;  %v1457_v46 = vpack.c.bf16 %v1225_v44, %v1223_v43  ;;  %v1898_v57 = vld [vmem:[%s3332_s25] ss:$0 sm:$0xff]  ;;  %v1247_v43 = vld [vmem:[#allocation38 + $0x38] sm:$0xff] }
 0xb8f   :  { %2053 = vmatprep.subr.bf16.mxu0 %v2813_v0 }
 0xb92   :  { %2054 = vmatpush3.bf16.msra.mxu0 %v1382_v62 }
 0xb93   :  { %2055 = vmatprep.subr.bf16.mxu0 %v2813_v0 }
 0xb96   :  { %2056 = vmatpush3.bf16.msra.mxu0 %v1383_v4 }
 0xb97   :  { %2057 = vmatprep.subr.bf16.mxu0 %v2813_v0 }
 0xb9a   :  { %2058 = vmatpush3.bf16.msra.mxu0 %v1384_v17  ;;  %v1236_v17 = vld [vmem:[#allocation36 + $0x48] sm:$0xff] }
 0xb9b   :  { %2059 = vmatprep.subr.bf16.mxu0 %v2813_v0 }
 0xb9e   :  { %2060 = vmatpush3.bf16.msra.mxu0 %v1385_v52 }
 0xb9f   :  { %2061 = vmatprep.subr.bf16.mxu0 %v2813_v0 }
 0xba2   :  { %2062 = vmatpush3.bf16.msra.mxu0 %v1386_v56 }
 0xba3   :  { %2067 = vmatprep.subr.bf16.mxu0 %v2813_v0 }
 0xc60   :  { %v1315_v8 = vpop.f32.mrb[20].mxu0 }
 0xc61   :  { %v1316_v9 = vadd.f32 %v1315_v8, %v1270_v2  ;;  %v1317_v10 = vpop.f32.mrb[21].mxu0  ;;  %v1230_v8 = vld [vmem:[#allocation36 + $0x18] sm:$0xff] }
 0xc62   :  { %v1318_v13 = vadd.f32 %v1317_v10, %v1274_v3  ;;  %v1319_v14 = vpop.f32.mrb[22].mxu0  ;;  %v1231_v10 = vld [vmem:[#allocation36 + $0x20] sm:$0xff] }
 0xc63   :  { %v1322_v18 = vmax.f32 %v1316_v9, 0.0  ;;  %v1320_v19 = vpop.f32.mrb[23].mxu0  ;;  %1439 = vrot.lane.b32.xlu0 %v1316_v9, %s2815_s5  ;;  %v1519_v9 = vpack.c.bf16 %v1230_v8, %v1229_v7  ;;  %v1520_v12 = vpack.c.bf16 %v1232_v11, %v1231_v10  ;;  %v1234_v14 = vld [vmem:[#allocation36 + $0x38] sm:$0xff] }
 0xc64   :  { %1441 = vrot.lane.b32.xlu1 %v1318_v13, %s2815_s5  ;;  %v1233_v13 = vld [vmem:[#allocation36 + $0x30] sm:$0xff]  ;;  %v1522_v19 = vpack.c.bf16 %v1236_v17, %v1235_v16 }
 0xc65   :  { %v1323_v22 = vpack.c.bf16 %v1322_v18, %v1322_v18  ;;  %v1521_v15 = vpack.c.bf16 %v1234_v14, %v1233_v13  ;;  %v1226_v18 = vld [vmem:[%s3333_s1] sm:$0x3] }
 0xc66   :  { %v1466_v24 = vrot.slane %v1226_v18, %v1273_v61 }
 0xc67   :  { %2048 = vmatmul.mubr.msk.bf16.vlgmr.msra.gmra.mrb[20].mxu1 %vm1277_vm7, %v1323_v22  ;;  %v1237_v22 = vld [vmem:[#allocation36 + $0x50] sm:$0xff] }
 0xc68   :  { %1473 = vmatpush1.bf16.msra.mxu1 %v1446_v20  ;;  %1504 = vmatprep.mubr.bf16.mxu1 %v2817_v26  ;;  %v1220_v26 = vld [vmem:[#allocation35 + $0x90] sm:$0xff]  ;;  %v1462_v20 = vrot.slane %v1226_v18, %v1269_v59 }
 0xc69   :  { %1474 = vmatprep.subr.bf16.mxu1 %v1449_v23  ;;  %v1454_v45 = vpack.c.bf16 %v1220_v26, %v1218_v42  ;;  %v1238_v23 = vld [vmem:[#allocation36 + $0x58] sm:$0xff]  ;;  %v1246_v26 = vld [vmem:[#allocation38 + $0x30] sm:$0xff] }
 0xc6a   :  { %v1523_v27 = vpack.c.bf16 %v1238_v23, %v1237_v22  ;;  %v1580_v44 = vpack.c.bf16 %v1247_v43, %v1246_v26 }
 0xc6c   :  { %1475 = vmatpush1.bf16.msra.mxu1 %v1448_v29 }
 0xc6d   :  { %1476 = vmatprep.subr.bf16.mxu1 %v1451_v30 }
 0xc70   :  { %1477 = vmatpush1.bf16.msra.mxu1 %v1450_v35  ;;  %v1240_v35 = vld [vmem:[#allocation38] sm:$0xff] }
 0xc71   :  { %1478 = vmatprep.subr.bf16.mxu1 %v1453_v36  ;;  %v1241_v36 = vld [vmem:[#allocation38 + $0x8] sm:$0xff] }
 0xc72   :  { %v1577_v37 = vpack.c.bf16 %v1241_v36, %v1240_v35 }
 0xc74   :  { %1479 = vmatpush1.bf16.msra.mxu1 %v1452_v40  ;;  %v1244_v40 = vld [vmem:[#allocation38 + $0x20] sm:$0xff] }
 0xc75   :  { %1480 = vmatprep.subr.bf16.mxu1 %v1455_v41  ;;  %v1245_v41 = vld [vmem:[#allocation38 + $0x28] sm:$0xff] }
 0xc76   :  { %v1579_v42 = vpack.c.bf16 %v1245_v41, %v1244_v40 }
 0xc78   :  { %1481 = vmatpush1.bf16.msra.mxu1 %v1454_v45  ;;  %v1248_v45 = vld [vmem:[#allocation38 + $0x40] sm:$0xff] }
 0xc79   :  { %1482 = vmatprep.subr.bf16.mxu1 %v1457_v46  ;;  %v1249_v46 = vld [vmem:[#allocation38 + $0x48] sm:$0xff] }
 0xc7a   :  { %v1581_v47 = vpack.c.bf16 %v1249_v46, %v1248_v45 }
 0xc7c   :  { %1483 = vmatpush1.bf16.msra.mxu1 %v1456_v49  ;;  %v1251_v49 = vld [vmem:[#allocation38 + $0x58] sm:$0xff] }
 0xc7d   :  { %2083 = vmatprep.subr.bf16.mxu1 %v2813_v0  ;;  %v1582_v50 = vpack.c.bf16 %v1251_v49, %v1250_v48 }
 0xc7f   :  { %1902 = vmatmul.mubr.msk.bf16.vlgmr.msra.gmra.mrb[24].mxu1 %vm1277_vm7, %v3186_v21  ;;  %v1227_v21 = vld [vmem:[#allocation36] sm:$0xff] }
 0xc80   :  { %2095 = vmatprep.mubr.msk.bf16.mxu1 %vm2814_vm0, %v2813_v0  ;;  %v1518_v4 = vpack.c.bf16 %v1228_v63, %v1227_v21  ;;  %2084 = vmatpush3.bf16.msra.mxu1 %v1577_v37 }
 0xc81   :  { %2085 = vmatprep.subr.bf16.mxu1 %v2813_v0 }
 0xc84   :  { %2086 = vmatpush3.bf16.msra.mxu1 %v1578_v6 }
 0xc85   :  { %2087 = vmatprep.subr.bf16.mxu1 %v2813_v0 }
 0xc88   :  { %2088 = vmatpush3.bf16.msra.mxu1 %v1579_v42 }
 0xc89   :  { %2089 = vmatprep.subr.bf16.mxu1 %v2813_v0 }
 0xc8c   :  { %2090 = vmatpush3.bf16.msra.mxu1 %v1580_v44 }
 0xc8d   :  { %2091 = vmatprep.subr.bf16.mxu1 %v2813_v0 }
 0xc90   :  { %2092 = vmatpush3.bf16.msra.mxu1 %v1581_v47 }
 0xc91   :  { %2093 = vmatprep.subr.bf16.mxu1 %v2813_v0 }
 0xc94   :  { %2094 = vmatpush3.bf16.msra.mxu1 %v1582_v50 }
 0xcd5   :  { %v1440_v52 = vpop.permute.xlu0 %1439 }
 0xcd6   :  { %v1442_v55 = vpop.permute.xlu1 %1441 }
 0xcd7   :  { %v1443_v21 = vsel %vm559_vm4, %v1440_v52, %v1442_v55 }
 0xd3a   :  { %v1373_v58 = vpop.f32.mrb[20].mxu1 }
 0xd3b   :  { %v1374_v60 = vadd.f32 %v1898_v57, %v1373_v58  ;;  %v2049_v62 = vpop.f32.mrb[21].mxu1 }
 0xd3c   :  { %v1376_v1 = vpop.f32.mrb[22].mxu1 }
 0xd3d   :  { %v1379_v2 = vmax.f32 %v1374_v60, 0.0  ;;  %v2050_v3 = vpop.f32.mrb[23].mxu1 }
 0xd3f   :  { %v1380_v5 = vpack.c.bf16 %v1379_v2, %v1379_v2  ;;  %v1903_v2 = vld [vmem:[%s2982_s27] ss:$0 sm:$0xff] }
 0xd41   :  { %2064 = vmatmul.mubr.msk.bf16.vlgmr.msra.gmra.mrb[24].mxu0 %vm1277_vm7, %v1380_v5 }
 0xd42   :  { %2068 = vmatpush3.bf16.msra.mxu0 %v1518_v4  ;;  %2079 = vmatprep.mubr.msk.bf16.mxu0 %vm2814_vm0, %v2813_v0 }
 0xd43   :  { %2069 = vmatprep.subr.bf16.mxu0 %v2813_v0 }
 0xd46   :  { %2070 = vmatpush3.bf16.msra.mxu0 %v1519_v9 }
 0xd47   :  { %2071 = vmatprep.subr.bf16.mxu0 %v2813_v0 }
 0xd4a   :  { %2072 = vmatpush3.bf16.msra.mxu0 %v1520_v12 }
 0xd4b   :  { %2073 = vmatprep.subr.bf16.mxu0 %v2813_v0 }
 0xd4e   :  { %2074 = vmatpush3.bf16.msra.mxu0 %v1521_v15  ;;  %v1905_v15 = vld [vmem:[%s2992_s12] ss:$0 sm:$0xff] }
 0xd4f   :  { %2075 = vmatprep.subr.bf16.mxu0 %v2813_v0 }
 0xd52   :  { %v1506_v25 = vpop.f32.mrb[24].mxu1  ;;  %2076 = vmatpush3.bf16.msra.mxu0 %v1522_v19 }
 0xd53   :  { %v1507_v28 = vadd.f32 %v1506_v25, %v1462_v20  ;;  %v1508_v29 = vpop.f32.mrb[25].mxu1  ;;  %2077 = vmatprep.subr.bf16.mxu0 %v2813_v0 }
 0xd54   :  { %v1509_v30 = vadd.f32 %v1508_v29, %v1466_v24  ;;  %v1510_v31 = vpop.f32.mrb[26].mxu1 }
 0xd55   :  { %v1511_v32 = vadd.f32 %v1510_v31, %v1462_v20  ;;  %v1512_v33 = vpop.f32.mrb[27].mxu1  ;;  %1639 = vrot.lane.b32.xlu0 %v1507_v28, %s2815_s5  ;;  %v1515_v59 = vmax.f32 %v1507_v28, 0.0 }
 0xd56   :  { %1641 = vrot.lane.b32.xlu1 %v1509_v30, %s2815_s5  ;;  %2078 = vmatpush3.bf16.msra.mxu0 %v1523_v27  ;;  %v1513_v53 = vadd.f32 %v1512_v33, %v1466_v24  ;;  %v1702_v33 = vld [vmem:[%s3335_s24] sm:$0xff] }
 0xd57   :  { %v1516_v34 = vmax.f32 %v1511_v32, 0.0  ;;  %2099 = vmatprep.subr.bf16.mxu0 %v2813_v0 }
 0xd59   :  { %v1517_v61 = vpack.c.bf16 %v1516_v34, %v1515_v59  ;;  %1643 = vrot.lane.b32.xlu0 %v1511_v32, %s2815_s5  ;;  %v1703_v59 = vld [vmem:[%s3335_s24 + $0x8] sm:$0xff]  ;;  %v1704_v34 = vsub.f32 1.0, %v1702_v33 }
 0xd5a   :  { %1645 = vrot.lane.b32.xlu1 %v1513_v53, %s2815_s5  ;;  %v1705_v53 = vsub.f32 1.0, %v1703_v59 }
 0xd5b   :  { %2080 = vmatmul.mubr.msk.bf16.vlgmr.msra.gmra.mrb[28].mxu0 %vm1277_vm7, %v1517_v61 }
 0xd5c   :  { %2101 = vmatprep.mubr.msk.bf16.mxu0 %vm2814_vm0, %v2813_v0 }
 0xdc7   :  { %v1640_v13 = vpop.permute.xlu0 %1639 }
 0xdc8   :  { %v1642_v14 = vpop.permute.xlu1 %1641 }
 0xdc9   :  { %v1647_v28 = vsel %vm559_vm4, %v1640_v13, %v1642_v14 }
 0xdcb   :  { %v1644_v19 = vpop.permute.xlu0 %1643 }
 0xdcc   :  { %v1646_v22 = vpop.permute.xlu1 %1645 }
 0xdcd   :  { %v1648_v29 = vsel %vm559_vm4, %v1644_v19, %v1646_v22 }
 0xe14   :  { %v1430_v54 = vpop.f32.mrb[24].mxu0 }
 0xe15   :  { %v1431_v56 = vadd.f32 %v1900_v51, %v1430_v54  ;;  %v2065_v57 = vpop.f32.mrb[25].mxu0 }
 0xe16   :  { %v1433_v58 = vpop.f32.mrb[26].mxu0 }
 0xe17   :  { %v1436_v60 = vmax.f32 %v1431_v56, 0.0  ;;  %v2066_v62 = vpop.f32.mrb[27].mxu0 }
 0xe19   :  { %v1445_v63 = vadd.f32 %v1443_v21, %v1436_v60 }
 0xe1b   :  { %v1654_v1 = vpack.c.bf16 %v1445_v63, %v1445_v63 }
 0xe1d   :  { %v1659_v0 = vsel %vm1277_vm7, %v1654_v1, 0 }
 0xe1e   :  { %2100 = vmatpush3.bf16.xpose.msra.mxu0 %v1659_v0 }
 0xe2e   :  { %v1567_v3 = vpop.f32.mrb[28].mxu0 }
 0xe2f   :  { %v1568_v4 = vadd.f32 %v1903_v2, %v1567_v3  ;;  %v2081_v5 = vpop.f32.mrb[29].mxu0 }
 0xe30   :  { %v1570_v7 = vpop.f32.mrb[30].mxu0 }
 0xe31   :  { %v1571_v8 = vadd.f32 %v1903_v2, %v1570_v7  ;;  %v2082_v9 = vpop.f32.mrb[31].mxu0  ;;  %v1574_v10 = vmax.f32 %v1568_v4, 0.0 }
 0xe33   :  { %v1575_v11 = vmax.f32 %v1571_v8, 0.0 }
 0xe35   :  { %v1576_v12 = vpack.c.bf16 %v1575_v11, %v1574_v10 }
 0xe37   :  { %2096 = vmatmul.mubr.msk.bf16.vlgmr.msra.gmra.mrb[28].mxu1 %vm1277_vm7, %v1576_v12 }
 0xf0a   :  { %v1626_v16 = vpop.f32.mrb[28].mxu1 }
 0xf0b   :  { %v1627_v17 = vadd.f32 %v1905_v15, %v1626_v16  ;;  %v2097_v18 = vpop.f32.mrb[29].mxu1 }
 0xf0c   :  { %v1629_v20 = vpop.f32.mrb[30].mxu1 }
 0xf0d   :  { %v1633_v23 = vmax.f32 %v1627_v17, 0.0  ;;  %v1630_v24 = vadd.f32 %v1905_v15, %v1629_v20  ;;  %v2098_v25 = vpop.f32.mrb[31].mxu1 }
 0xf0f   :  { %v1634_v27 = vmax.f32 %v1630_v24, 0.0  ;;  %v1651_v30 = vadd.f32 %v1647_v28, %v1633_v23 }
 0xf11   :  { %v1652_v31 = vadd.f32 %v1648_v29, %v1634_v27 }
 0xf13   :  { %v1653_v32 = vpack.c.bf16 %v1652_v31, %v1651_v30 }
 0xf15   :  { %2102 = vmatmul.mubr.msk.bf16.vlgmr.msra.gmra.mrb[32].mxu0 %vm1277_vm7, %v1653_v32 }
 0xfe8   :  { %v1695_v61 = vpop.f32.mrb[32].mxu0 }
 0xfe9   :  { %v1706_v35 = vmul.f32 %v1702_v33, %v1695_v61  ;;  %v3277_v36 = vmul.f32 %v1704_v34, %v1695_v61  ;;  %v2103_v37 = vpop.f32.mrb[33].mxu0 }
 0xfea   :  { %v1698_v38 = vpop.f32.mrb[34].mxu0 }
 0xfeb   :  { %v1710_v39 = vsub.f32 0.0, %v1706_v35  ;;  %v1760_v6 = vsub.f32 0.0, %v3277_v36  ;;  %v1707_v40 = vmul.f32 %v1703_v59, %v1698_v38  ;;  %v3280_v41 = vmul.f32 %v1705_v53, %v1698_v38  ;;  %v2104_v42 = vpop.f32.mrb[35].mxu0 }
 0xfed   :  { %v1714_v26 = vand.u32 2147483647, %v1710_v39  ;;  %v1764_v43 = vand.u32 2147483647, %v1760_v6  ;;  %v1711_v44 = vsub.f32 0.0, %v1707_v40  ;;  %v1761_v45 = vsub.f32 0.0, %v3280_v41 }
 0xfee   :  { %v1712_v12 = vmax.f32 %v1710_v39, 0.0  ;;  %v1762_v24 = vmax.f32 %v1760_v6, 0.0 }
 0xfef   :  { %v1716_v46 = vsub.f32 0.0, %v1714_v26  ;;  %v1766_v47 = vsub.f32 0.0, %v1764_v43  ;;  %v1715_v48 = vand.u32 2147483647, %v1711_v44  ;;  %v1765_v49 = vand.u32 2147483647, %v1761_v45 }
 0xff0   :  { %v1713_v25 = vmax.f32 %v1711_v44, 0.0  ;;  %v1763_v53 = vmax.f32 %v1761_v45, 0.0 }
 0xff1   :  { %v1718_v50 = vmul.f32 1.442695, %v1716_v46  ;;  %v1768_v51 = vmul.f32 1.442695, %v1766_v47  ;;  %v1717_v52 = vsub.f32 0.0, %v1715_v48  ;;  %v1767_v54 = vsub.f32 0.0, %v1765_v49 }
 0xff3   :  { %2182 = vpow2.f32 %v1718_v50  ;;  %v1720_v55 = vmul.f32 1.442695, %v1717_v52  ;;  %v1770_v56 = vmul.f32 1.442695, %v1767_v54 }
 0xff4   :  { %2184 = vpow2.f32 %v1768_v51 }
 0xff5   :  { %2186 = vpow2.f32 %v1720_v55 }
 0xff6   :  { %2188 = vpow2.f32 %v1770_v56 }
 0xffd   :  { %v2183_v57 = vpop.eup %2182 }
 0xffe   :  { %v2185_v58 = vpop.eup %2184  ;;  %v1722_v60 = vadd.f32 1.0, %v2183_v57  ;;  %v1725_v2 = vmul.f32 -0.5, %v2183_v57  ;;  %v1728_v9 = vand.u32 2147483647, %v2183_v57 }
 0xfff   :  { %v1772_v62 = vadd.f32 1.0, %v2185_v58  ;;  %v2187_v21 = vpop.eup %2186  ;;  %v1775_v3 = vmul.f32 -0.5, %v2185_v58  ;;  %v1778_v10 = vand.u32 2147483647, %v2185_v58 }
0x1000   :  { %2190 = vlog2.f32 %v1722_v60  ;;  %v2189_v63 = vpop.eup %2188  ;;  %v1731_v1 = vadd.f32 1.0, %v2187_v21  ;;  %v1734_v4 = vmul.f32 -0.5, %v2187_v21  ;;  %v1726_v7 = vadd.f32 1.0, %v1725_v2 }
0x1001   :  { %2192 = vlog2.f32 %v1772_v62  ;;  %v1781_v0 = vadd.f32 1.0, %v2189_v63  ;;  %v1784_v5 = vmul.f32 -0.5, %v2189_v63  ;;  %v1776_v8 = vadd.f32 1.0, %v1775_v3 }
0x1002   :  { %2194 = vlog2.f32 %v1731_v1  ;;  %v1735_v13 = vadd.f32 1.0, %v1734_v4  ;;  %v1727_v17 = vmul.f32 %v2183_v57, %v1726_v7  ;;  %v1737_v18 = vand.u32 2147483647, %v2187_v21 }
0x1003   :  { %2196 = vlog2.f32 %v1781_v0  ;;  %v1785_v15 = vadd.f32 1.0, %v1784_v5  ;;  %v1777_v20 = vmul.f32 %v2185_v58, %v1776_v8  ;;  %v1787_v22 = vand.u32 2147483647, %v2189_v63 }
0x1004   :  { %vm1729_vm8 = vcmp.lt.f32.partialorder %v1728_v9, 0.0004427343  ;;  %vm1779_vm9 = vcmp.lt.f32.partialorder %v1778_v10, 0.0004427343  ;;  %v1736_v31 = vmul.f32 %v2187_v21, %v1735_v13  ;;  %vm1738_vm10 = vcmp.lt.f32.partialorder %v1737_v18, 0.0004427343 }
0x1005   :  { %v1786_v34 = vmul.f32 %v2189_v63, %v1785_v15  ;;  %vm1788_vm11 = vcmp.lt.f32.partialorder %v1787_v22, 0.0004427343 }
0x100a   :  { %v2191_v11 = vpop.eup %2190 }
0x100b   :  { %v2193_v14 = vpop.eup %2192  ;;  %v1724_v16 = vmul.f32 0.6931472, %v2191_v11 }
0x100c   :  { %v1774_v19 = vmul.f32 0.6931472, %v2193_v14  ;;  %v2195_v23 = vpop.eup %2194 }
0x100d   :  { %v1730_v27 = vsel %vm1729_vm8, %v1727_v17, %v1724_v16  ;;  %v2197_v28 = vpop.eup %2196  ;;  %v1733_v30 = vmul.f32 0.6931472, %v2195_v23 }
0x100e   :  { %v1780_v29 = vsel %vm1779_vm9, %v1777_v20, %v1774_v19  ;;  %v1740_v32 = vadd.f32 %v1730_v27, %v1712_v12  ;;  %v1783_v59 = vmul.f32 0.6931472, %v2197_v28 }
0x100f   :  { %v1790_v33 = vadd.f32 %v1780_v29, %v1762_v24  ;;  %v1739_v61 = vsel %vm1738_vm10, %v1736_v31, %v1733_v30 }
0x1010   :  { %v1789_v37 = vsel %vm1788_vm11, %v1786_v34, %v1783_v59  ;;  %v1741_v38 = vadd.f32 %v1739_v61, %v1713_v25  ;;  %v1742_v39 = vsub.f32 0.6931472, %v1740_v32 }
0x1011   :  { %v1792_v35 = vadd.f32 %v1790_v33, %v3277_v36  ;;  %v1791_v6 = vadd.f32 %v1789_v37, %v1763_v53 }
0x1012   :  { %v1743_v40 = vsub.f32 0.6931472, %v1741_v38  ;;  %v1745_v43 = vsel %vm1744_vm12, %v1742_v39, 0.0 }
0x1013   :  { %v1908_v42 = vadd.f32 -0.6931472, %v1792_v35  ;;  %v1793_v26 = vadd.f32 %v1791_v6, %v3280_v41 }
0x1014   :  { %v1746_v44 = vsel %vm1744_vm12, %v1743_v40, 0.0 }
0x1015   :  { %v1909_v46 = vadd.f32 -0.6931472, %v1793_v26  ;;  %v1747_v47 = vadd.f32 %v1746_v44, %v1745_v43  ;;  %v1796_v48 = vsel %vm1744_vm12, %v1908_v42, 0.0 }
0x1017   :  { %1748 = vadd.xlane.f32.xlu0 %v1747_v47  ;;  %v1797_v45 = vsel %vm1744_vm12, %v1909_v46, 0.0 }
0x1018   :  { %v1798_v49 = vadd.f32 %v1797_v45, %v1796_v48 }
0x101a   :  { %1799 = vadd.xlane.f32.xlu1 %v1798_v49 }
0x10a4   :  { %v1749_v50 = vpop.xlane.xlu0 %1748 }
0x10a5   :  { %v1750_v36 = vrot.slane %v1749_v50, 4 }
0x10a7   :  { %v1751_v51 = vadd.f32 %v1750_v36, %v1749_v50  ;;  %v1800_v52 = vpop.xlane.xlu1 %1799 }
0x10a8   :  { %v1801_v54 = vrot.slane %v1800_v52, 4 }
0x10a9   :  { %v1752_v55 = vrot.slane %v1751_v51, 2 }
0x10aa   :  { %v1802_v56 = vadd.f32 %v1801_v54, %v1800_v52 }
0x10ab   :  { %v1753_v57 = vadd.f32 %v1752_v55, %v1751_v51 }
0x10ac   :  { %v1803_v58 = vrot.slane %v1802_v56, 2 }
0x10ad   :  { %v1754_v60 = vrot.slane %v1753_v57, 1 }
0x10ae   :  { %v1804_v41 = vadd.f32 %v1803_v58, %v1802_v56 }
0x10af   :  { %v1755_v62 = vadd.f32 %v1754_v60, %v1753_v57 }
0x10b0   :  { %v1805_v21 = vrot.slane %v1804_v41, 1 }
0x10b1   :  { %2105 = vpush %v1755_v62 }
0x10b2   :  { %v1806_v63 = vadd.f32 %v1805_v21, %v1804_v41 }
0x10b4   :  { %2107 = vpush %v1806_v63 }
0x10e2   :  { %s2106_s12 = spop %2105 }
0x10e3   :  { %s1759_s27 = smul.f32 0.0625, %s2106_s12 }
0x10e5   :  { %s2108_s8 = spop %2107 }
0x10e6   :  { %s1810_s21 = smul.f32 0.0625, %s2108_s8 }
0x10e8   :  { %s1811_s11 = ssub.f32 %s1810_s21, %s1759_s27 }
0x10ea   :  { %v1812_v1 = vstv %s1811_s11 }
0x10eb   :  { %1814 = vst.msk [vmem:[#allocation39] sm:$0x1] %vm1813_vm13, %v1812_v1 }
0x10ec   :  { %2715 = shalt.err (!%p2712_p6)
}
0x10ed   :  { %s2716_s16 = scalar_lea.hbm %s2997_s19, 16 }
0x10ee   :  { %p2717_p7 = scmp.ne.s32.totalorder %s2997_s19, %s2716_s16  ;;  %p2720_p8 = scmp.lt.u32.totalorder %s2716_s16, %s2997_s19 }
0x10f0   :  { %p2722_p9 = pnand %p2720_p8, %p2717_p7 }
0x10f2   :  { %2725 = shalt.err (!%p2722_p9)
}
0x10f3   :  { %1824 = dma.vmem_to_hbm [thread:$0]  %s1822_s6, 16, %s2997_s19, [#allocation5]  }
0x10f4   :  { %2750 = dma.done.wait [#allocation5], 16  }
0x10f5   :  { %2751 = vsyncadd [#allocation5], 4294967280 }
0x10f6   :  { %1828 = vsyncpa [#allocation4], 1 }
0x10f7   :  { %1829 = vsyncpa [#allocation7], 1 }
0x10f8   :  { %1830 = vsyncpa [#allocation10], 1 }
0x10f9   :  { %1831 = vsyncpa [#allocation13], 1 }
0x10fa   :  { %1832 = vsyncpa [#allocation16], 1 }
0x10fb   :  { %1833 = vsyncpa [#allocation19], 1 }
0x10fc   :  { %1834 = vsyncpa [#allocation22], 1 }
0x10fd   :  { %1835 = vsyncpa [#allocation25], 1 }
0x10fe   :  { %1836 = vsyncpa [#allocation28], 1 }
0x10ff   :  { %1837 = vsyncpa [#allocation31], 1 }
0x1100   :  { %1838 = vsyncpa [#allocation34], 1 }
0x1101   :  { %1839 = vsyncpa [#allocation37], 1 }
0x1102   :  { %1840 = vsyncpa [#allocation5], 1 }

</bundles_post_ra>
